<compile_context>
chip_gen: v5e
topology: v5e:2x2
jax: 0.10.0
libtpu: 0.0.40
codegen_flags: <defaults>
</compile_context>

<pallas_src>
import functools

import numpy as np
import jax
import jax.numpy as jnp
from jax.experimental import pallas as pl
from jax.experimental.pallas import tpu as pltpu

EPS = 1e-5
HIGHEST = jax.lax.Precision.HIGHEST


# --------------------------- small helpers ---------------------------
def _layernorm(x, w, b, eps=EPS):
    mu = jnp.mean(x, axis=-1, keepdims=True)
    var = jnp.mean((x - mu) ** 2, axis=-1, keepdims=True)
    return (x - mu) * jax.lax.rsqrt(var + eps) * w + b


def _dot_hi(a, b):
    # f32 HIGHEST matmul: group path (group_prob/break_prob parity) + pure-JAX reference.
    return jnp.dot(a, b, precision=HIGHEST, preferred_element_type=jnp.float32)


def _bmm_hi(eq, a, b):
    return jnp.einsum(eq, a, b, precision=HIGHEST, preferred_element_type=jnp.float32)


def _dot_bf16(a, b):
    # relaxed precision: bf16 operands (weights already stored bf16 host-side), f32 accumulation.
    return jnp.dot(a.astype(jnp.bfloat16), b, preferred_element_type=jnp.float32)


def _softmax(x, approx=False):
    m = jnp.max(x, axis=-1, keepdims=True)
    e = jnp.exp(x - m)
    den = jnp.sum(e, axis=-1, keepdims=True)
    if approx:
        return e * pl.reciprocal(den, approx=True)   # EUP slot
    return e / den


def _transpose_last2(x):
    # batched minor-dims transpose (XLU); bb == 1 collapses to a plain 2-D transpose.
    if x.shape[0] == 1:
        return x[0].T[None]
    return jnp.swapaxes(x, -1, -2)


# ------------------------------ kernel ------------------------------
def encoder_kernel(seq_ref, prior_ref,
                   gnw, gnb, n1w, n1b, wgqk, bgqk,
                   wqkv, bqkv, ow, bo,
                   n2w, n2b, wl1, bl1, wl2, bl2,
                   seq_out_ref, gp_out_ref, bp_out_ref, *maybe_attn,
                   num_heads, emit_attn):
    bb, S, D = seq_ref.shape
    H = num_heads
    Dh = D // H
    N = bb * S

    seq = seq_ref[...].reshape(N, D)             # (N, D) token slab (leading dims merged only)
    prior = prior_ref[...]                       # (bb, S, S)

    # structural masks -- built once per grid step.
    row = jax.lax.broadcasted_iota(jnp.int32, (S, S), 0)
    col = jax.lax.broadcasted_iota(jnp.int32, (S, S), 1)
    diag = row == col
    supd = col == row + 1
    nb_mask = diag | supd | (col == row - 1)
    tri_excl = (row < col).astype(jnp.float32)   # strict-upper ones: exclusive prefix-sum matrix

    # ---- shared LayerNorm statistics for group_norm and norm1 (same eps, different affine) ----
    mu = jnp.mean(seq, axis=-1, keepdims=True)
    var = jnp.mean((seq - mu) ** 2, axis=-1, keepdims=True)
    xn = (seq - mu) * jax.lax.rsqrt(var + EPS)
    gx = xn * gnw[...] + gnb[...]
    x1 = xn * n1w[...] + n1b[...]

    # --------- GroupAttention (f32 HIGHEST: feeds the next layer's prior) ---------
    gqk = _dot_hi(gx, wgqk[...]) + bgqk[...]     # fused (D, 2D) q/k projection; 1/sqrt(D) pre-folded
    gq = gqk[:, 0:D].reshape(bb, S, D)
    gk = gqk[:, D:2 * D].reshape(bb, S, D)
    gsc = _bmm_hi('bqd,bkd->bqk', gq, gk)        # neighbour scores
    gsc = jnp.where(nb_mask, gsc, -1e9)
    a = _softmax(gsc)                            # exact reciprocal on this path
    nb = jnp.sqrt(a * _transpose_last2(a) + 1e-9)
    nb = prior + (1.0 - prior) * nb              # break_prob (bb, S, S)

    # Prefix products collapse to a length-S prefix sum of log break-probs:
    #   g[q,j] (j>q) = prod_{k=q..j-1} nb[k,k+1] = exp(L[j]-L[q]),  L[i] = sum_{k<i} log(nb[k,k+1]+1e-9)
    nbs = jnp.sum(jnp.where(supd, nb, 0.0), axis=-1)           # (bb, S): super-diagonal of nb
    ll = jnp.log(nbs + 1e-9)
    L = _dot_hi(ll, tri_excl)                                   # exclusive prefix sum (tiny matmul)
    M = L[:, None, :] - L[:, :, None]                           # M[b,q,j] = L[j] - L[q]
    g_off = jnp.exp(jnp.where(col > row, M, -M)) + 1e-9
    g = jnp.where(diag, nb, g_off)                              # group_prob (bb, S, S)

    gp_out_ref[...] = g
    bp_out_ref[...] = nb

    # --------- Sparse multi-head self-attention (bf16 MXU, f32 accumulation) ---------
    qkv = _dot_bf16(x1, wqkv[...]) + bqkv[...]   # fused QKV; 1/sqrt(Dh) folded into the q part
    q3 = qkv[:, 0:D].reshape(bb, S, D)
    k3 = qkv[:, D:2 * D].reshape(bb, S, D)
    v3 = qkv[:, 2 * D:3 * D].reshape(bb, S, D)

    attn_acc = None
    for h in range(H):                           # statically unrolled: exact per-head FLOPs, no masks
        lo, hi = h * Dh, (h + 1) * Dh
        q_h = q3[:, :, lo:hi].astype(jnp.bfloat16)
        k_h = k3[:, :, lo:hi].astype(jnp.bfloat16)
        v_h = v3[:, :, lo:hi].astype(jnp.bfloat16)
        s_h = jnp.einsum('bqd,bkd->bqk', q_h, k_h,
                         preferred_element_type=jnp.float32)    # (bb, S, S)
        p_h = _softmax(s_h, approx=True) * g     # group-modulated probs (not renormalized)
        if emit_attn:
            maybe_attn[0][:, h * S:(h + 1) * S, :] = p_h.astype(maybe_attn[0].dtype)
        o_h = jnp.einsum('bqk,bkd->bqd', p_h.astype(jnp.bfloat16), v_h,
                         preferred_element_type=jnp.float32)    # (bb, S, Dh)
        # per-head slice of the output projection:  sum_h o_h @ W_o[:, h*Dh:(h+1)*Dh]^T
        #                                        == concat_h(o_h) @ W_o^T    (exact algebra)
        c_h = jnp.einsum('nd,od->no', o_h.reshape(N, Dh).astype(jnp.bfloat16),
                         ow[:, lo:hi], preferred_element_type=jnp.float32)
        attn_acc = c_h if attn_acc is None else attn_acc + c_h
    seq1 = seq + attn_acc + bo[...]              # dropout1 = identity

    # ------------------------------ MLP on norm2(seq1) ------------------------------
    x2 = _layernorm(seq1, n2w[...], n2b[...])
    h1 = jnp.maximum(_dot_bf16(x2, wl1[...]) + bl1[...], 0.0)   # relu
    seq2 = seq1 + _dot_bf16(h1, wl2[...]) + bl2[...]            # dropout2 = identity

    seq_out_ref[...] = seq2.reshape(bb, S, D)


# --------------------------- host-side param prep (done once) ---------------------------
def prepare_params(p, *, num_heads):
    """Pre-transpose / fuse weights, fold the 1/sqrt scales, and store the relaxed-precision
    weights (QKV, out-proj, MLP) as bf16.  Biases stay f32 (added to f32 accumulators)."""
    D = p["gqw"].shape[0]
    F = p["l1w"].shape[0]
    Dh = D // num_heads
    gscale = jnp.float32(1.0 / np.sqrt(D))
    ascale = jnp.float32(1.0 / np.sqrt(Dh))
    wgqk = jnp.concatenate([p["gqw"].T * gscale, p["gkw"].T], axis=1)             # (D, 2D) f32
    bgqk = jnp.concatenate([p["gqb"] * gscale, p["gkb"]]).reshape(1, 2 * D)
    cscale = jnp.concatenate([jnp.full((D,), ascale, jnp.float32),
                              jnp.ones((2 * D,), jnp.float32)])
    wqkv = (p["inw"].T * cscale[None, :]).astype(jnp.bfloat16)                    # (D, 3D) bf16
    bqkv = (p["inb"] * cscale).reshape(1, 3 * D)                                  # f32
    return [
        p["gnw"].reshape(1, D), p["gnb"].reshape(1, D),
        p["n1w"].reshape(1, D), p["n1b"].reshape(1, D),
        wgqk, bgqk,
        wqkv, bqkv,
        p["ow"].astype(jnp.bfloat16), p["ob"].reshape(1, D),   # out-proj kept (out,in): lane-sliced per head
        p["n2w"].reshape(1, D), p["n2b"].reshape(1, D),
        p["l1w"].T.astype(jnp.bfloat16), p["l1b"].reshape(1, F),
        p["l2w"].T.astype(jnp.bfloat16), p["l2b"].reshape(1, D),
    ]


# ------------------------------ wrapper ------------------------------
def _default_vmem_limit_bytes():
    # Raise the scoped-VMEM limit per generation (~3/4 of physical, capped): v5e/v6e -> 96 MiB,
    # v7x -> 48 MiB.  Falls back to a conservative value if the query is unavailable.
    try:
        cap = int(pltpu.get_tpu_info().vmem_capacity_bytes)
    except Exception:
        cap = 64 * 1024 * 1024
    return min((cap * 3) // 4, 100 * 1024 * 1024)


def encoder_layer(seq, prior, prepared_params, *, num_heads, batch_block=None,
                  emit_attn=True, attn_dtype=jnp.bfloat16, vmem_limit_bytes=None):
    B, S, D = seq.shape
    H = num_heads
    assert D % H == 0
    if batch_block is not None:
        bb = batch_block
    elif B % 2 == 0:
        bb = B // 2        # grid >= 2: both v7x TensorCores busy + writeback/compute pipelining
    else:
        bb = B
    assert B % bb == 0
    if vmem_limit_bytes is None:
        vmem_limit_bytes = _default_vmem_limit_bytes()
    plist = prepared_params

    def param_spec(p):
        # Full-array block with constant index -> fetched once, resident across grid steps.
        # NOTE: pl.Buffered(1) single-buffering was considered (review) but pipeline_mode on
        # top-level pallas_call BlockSpecs is not uniformly supported; bf16 weights + the raised
        # vmem limit keep the double-buffered residency well inside budget instead.
        return pl.BlockSpec(p.shape, lambda b, _nd=p.ndim: (0,) * _nd)

    in_specs = ([pl.BlockSpec((bb, S, D), lambda b: (b, 0, 0)),
                 pl.BlockSpec((bb, S, S), lambda b: (b, 0, 0))]
                + [param_spec(p) for p in plist])
    out_specs = [pl.BlockSpec((bb, S, D), lambda b: (b, 0, 0)),
                 pl.BlockSpec((bb, S, S), lambda b: (b, 0, 0)),
                 pl.BlockSpec((bb, S, S), lambda b: (b, 0, 0))]
    out_shape = [jax.ShapeDtypeStruct((B, S, D), jnp.float32),
                 jax.ShapeDtypeStruct((B, S, S), jnp.float32),
                 jax.ShapeDtypeStruct((B, S, S), jnp.float32)]
    if emit_attn:
        out_specs.append(pl.BlockSpec((bb, H * S, S), lambda b: (b, 0, 0)))
        out_shape.append(jax.ShapeDtypeStruct((B, H * S, S), attn_dtype))

    kernel = functools.partial(encoder_kernel, num_heads=H, emit_attn=emit_attn)
    outs = pl.pallas_call(
        kernel,
        grid=(B // bb,),
        in_specs=in_specs,
        out_specs=tuple(out_specs),
        out_shape=tuple(out_shape),
        compiler_params=pltpu.CompilerParams(
            dimension_semantics=("parallel",),
            vmem_limit_bytes=vmem_limit_bytes),
    )(seq, prior, *plist)
    if emit_attn:
        seq_out, gp, bp, attn_flat = outs
        return seq_out, gp, bp, attn_flat.reshape(B, H, S, S)
    seq_out, gp, bp = outs
    return seq_out, gp, bp, None


# ------------------------- pure-JAX reference (f32 HIGHEST ground truth) -------------------------
def _reference_single(seq, prior, p, num_heads):
    S, D = seq.shape
    H = num_heads
    Dh = D // H
    row = np.arange(S)[:, None]
    col = np.arange(S)[None, :]
    diag = jnp.asarray(row == col)
    supd = jnp.asarray(col == row + 1)
    subd = jnp.asarray(col == row - 1)
    tri = jnp.asarray((col >= row).astype(np.float32))

    gx = _layernorm(seq, p["gnw"], p["gnb"])
    gq = _dot_hi(gx, p["gqw"].T) + p["gqb"]
    gk = _dot_hi(gx, p["gkw"].T) + p["gkb"]
    sc = _dot_hi(gq, gk.T) / jnp.sqrt(jnp.float32(D))
    sc = jnp.where(diag | supd | subd, sc, -1e9)
    nb = jax.nn.softmax(sc, axis=-1)
    nb = jnp.sqrt(nb * nb.T + 1e-9)
    nb = prior + (1.0 - prior) * nb
    t = _dot_hi(jnp.where(supd, jnp.log(nb + 1e-9), 0.0), tri)
    g = jnp.exp(_dot_hi(tri, t))
    g = jnp.where((tri - diag.astype(jnp.float32)) == 0.0, 0.0, g)
    g = g + g.T + jnp.where(diag, nb, 1e-9)

    x1 = _layernorm(seq, p["n1w"], p["n1b"])
    qkv = _dot_hi(x1, p["inw"].T) + p["inb"]
    q, k, v = qkv[:, :D], qkv[:, D:2 * D], qkv[:, 2 * D:]
    outs, attns = [], []
    for h in range(H):
        qh = q[:, h * Dh:(h + 1) * Dh]
        kh = k[:, h * Dh:(h + 1) * Dh]
        vh = v[:, h * Dh:(h + 1) * Dh]
        ph = jax.nn.softmax(_dot_hi(qh, kh.T) / jnp.sqrt(jnp.float32(Dh)), axis=-1) * g
        attns.append(ph)
        outs.append(_dot_hi(ph, vh))
    attn = jnp.stack(attns, axis=0)
    attn_x = _dot_hi(jnp.concatenate(outs, -1), p["ow"].T) + p["ob"]
    seq1 = seq + attn_x
    x2 = _layernorm(seq1, p["n2w"], p["n2b"])
    m = _dot_hi(jnp.maximum(_dot_hi(x2, p["l1w"].T) + p["l1b"], 0.0), p["l2w"].T) + p["l2b"]
    return seq1 + m, g, nb, attn


def reference(seq, prior, p, num_heads):
    fn = functools.partial(_reference_single, p=p, num_heads=num_heads)
    return jax.vmap(fn)(seq, prior)


# ------------------------------- main -------------------------------
if __name__ == "__main__":
    B, S, D, H, F = 2, 16, 32, 4, 64
    key = jax.random.PRNGKey(0)
    ks = list(jax.random.split(key, 16))

    def xavier(k, out_dim, in_dim):
        lim = (6.0 / (in_dim + out_dim)) ** 0.5
        return jax.random.uniform(k, (out_dim, in_dim), jnp.float32, -lim, lim)

    params = {
        # group_norm / norm1 / norm2 (LayerNorm affine)
        "gnw": jnp.ones((D,), jnp.float32), "gnb": jnp.zeros((D,), jnp.float32),
        "n1w": jnp.ones((D,), jnp.float32), "n1b": jnp.zeros((D,), jnp.float32),
        "n2w": jnp.ones((D,), jnp.float32), "n2b": jnp.zeros((D,), jnp.float32),
        # GroupAttention key/query projections
        "gqw": xavier(ks[0], D, D), "gqb": 0.01 * jax.random.normal(ks[1], (D,), jnp.float32),
        "gkw": xavier(ks[2], D, D), "gkb": 0.01 * jax.random.normal(ks[3], (D,), jnp.float32),
        # SparseMultiHeadSelfAttention in/out projections
        "inw": xavier(ks[4], 3 * D, D), "inb": jnp.zeros((3 * D,), jnp.float32),
        "ow": xavier(ks[5], D, D), "ob": jnp.zeros((D,), jnp.float32),
        # MLP
        "l1w": xavier(ks[6], F, D), "l1b": 1e-6 + 0.01 * jax.random.normal(ks[7], (F,), jnp.float32),
        "l2w": xavier(ks[8], D, F), "l2b": 1e-6 + 0.01 * jax.random.normal(ks[9], (D,), jnp.float32),
    }

    seq = jax.random.normal(ks[10], (B, S, D), jnp.float32)
    prior = jnp.zeros((B, S, S), jnp.float32)   # initial group_prob (None -> 0 prior)

    prep = prepare_params(params, num_heads=H)   # done once, not per forward call
    out = encoder_layer(seq, prior, prep, num_heads=H)
    out = jax.block_until_ready(out)
    seq_out, group_prob, break_prob, attn = out

    ref = reference(seq, prior, params, H)
    # Looser tolerances on the attention/MLP path reflect the deliberate bf16-MXU relaxation and
    # bf16 attention-prob emission (perf review); the f32 HIGHEST group path stays tight.
    names = ["seq", "group_prob", "break_prob", "attn"]
    tols = [(5e-2, 5e-2), (1e-4, 1e-4), (1e-4, 1e-4), (2e-2, 2e-2)]
    for name, got, want, (rtol, atol) in zip(names, out, ref, tols):
        np.testing.assert_allclose(np.asarray(got, dtype=np.float32),
                                   np.asarray(want, dtype=np.float32),
                                   rtol=rtol, atol=atol, err_msg=name)

    assert seq_out.shape == (B, S, D)
    assert group_prob.shape == (B, S, S)
    assert break_prob.shape == (B, S, S)
    assert attn.shape == (B, H, S, S)
    print("KERNEL_OK")
</pallas_src>

<mosaic_0001>
module attributes {stable_mosaic.version = 11 : i64} {
  func.func @encoder_kernel(%arg0: i32, %arg1: memref<1x16x32xf32, #tpu.memory_space<vmem>>, %arg2: memref<1x16x16xf32, #tpu.memory_space<vmem>>, %arg3: memref<1x32xf32, #tpu.memory_space<vmem>>, %arg4: memref<1x32xf32, #tpu.memory_space<vmem>>, %arg5: memref<1x32xf32, #tpu.memory_space<vmem>>, %arg6: memref<1x32xf32, #tpu.memory_space<vmem>>, %arg7: memref<32x64xf32, #tpu.memory_space<vmem>>, %arg8: memref<1x64xf32, #tpu.memory_space<vmem>>, %arg9: memref<32x96xbf16, #tpu.memory_space<vmem>>, %arg10: memref<1x96xf32, #tpu.memory_space<vmem>>, %arg11: memref<32x32xbf16, #tpu.memory_space<vmem>>, %arg12: memref<1x32xf32, #tpu.memory_space<vmem>>, %arg13: memref<1x32xf32, #tpu.memory_space<vmem>>, %arg14: memref<1x32xf32, #tpu.memory_space<vmem>>, %arg15: memref<32x64xbf16, #tpu.memory_space<vmem>>, %arg16: memref<1x64xf32, #tpu.memory_space<vmem>>, %arg17: memref<64x32xbf16, #tpu.memory_space<vmem>>, %arg18: memref<1x32xf32, #tpu.memory_space<vmem>>, %arg19: memref<1x16x32xf32, #tpu.memory_space<vmem>>, %arg20: memref<1x16x16xf32, #tpu.memory_space<vmem>>, %arg21: memref<1x16x16xf32, #tpu.memory_space<vmem>>, %arg22: memref<1x64x16xbf16, #tpu.memory_space<vmem>>) attributes {dimension_semantics = [#tpu.dimension_semantics<parallel>], iteration_bounds = array<i64: 2>, scalar_prefetch = 0 : i64, scratch_operands = 0 : i64, tpu.core_type = #tpu.core_type<tc>, window_params = [{transform_indices = @transform_0, window_bounds = array<i64: 1, 16, 32>}, {transform_indices = @transform_1, window_bounds = array<i64: 1, 16, 16>}, {pipeline_mode = #tpu.pipeline_mode<synchronous>, transform_indices = @transform_2, window_bounds = array<i64: 1, 32>}, {pipeline_mode = #tpu.pipeline_mode<synchronous>, transform_indices = @transform_3, window_bounds = array<i64: 1, 32>}, {pipeline_mode = #tpu.pipeline_mode<synchronous>, transform_indices = @transform_4, window_bounds = array<i64: 1, 32>}, {pipeline_mode = #tpu.pipeline_mode<synchronous>, transform_indices = @transform_5, window_bounds = array<i64: 1, 32>}, {pipeline_mode = #tpu.pipeline_mode<synchronous>, transform_indices = @transform_6, window_bounds = array<i64: 32, 64>}, {pipeline_mode = #tpu.pipeline_mode<synchronous>, transform_indices = @transform_7, window_bounds = array<i64: 1, 64>}, {pipeline_mode = #tpu.pipeline_mode<synchronous>, transform_indices = @transform_8, window_bounds = array<i64: 32, 96>}, {pipeline_mode = #tpu.pipeline_mode<synchronous>, transform_indices = @transform_9, window_bounds = array<i64: 1, 96>}, {pipeline_mode = #tpu.pipeline_mode<synchronous>, transform_indices = @transform_10, window_bounds = array<i64: 32, 32>}, {pipeline_mode = #tpu.pipeline_mode<synchronous>, transform_indices = @transform_11, window_bounds = array<i64: 1, 32>}, {pipeline_mode = #tpu.pipeline_mode<synchronous>, transform_indices = @transform_12, window_bounds = array<i64: 1, 32>}, {pipeline_mode = #tpu.pipeline_mode<synchronous>, transform_indices = @transform_13, window_bounds = array<i64: 1, 32>}, {pipeline_mode = #tpu.pipeline_mode<synchronous>, transform_indices = @transform_14, window_bounds = array<i64: 32, 64>}, {pipeline_mode = #tpu.pipeline_mode<synchronous>, transform_indices = @transform_15, window_bounds = array<i64: 1, 64>}, {pipeline_mode = #tpu.pipeline_mode<synchronous>, transform_indices = @transform_16, window_bounds = array<i64: 64, 32>}, {pipeline_mode = #tpu.pipeline_mode<synchronous>, transform_indices = @transform_17, window_bounds = array<i64: 1, 32>}, {transform_indices = @transform_18, window_bounds = array<i64: 1, 16, 32>}, {transform_indices = @transform_19, window_bounds = array<i64: 1, 16, 16>}, {transform_indices = @transform_20, window_bounds = array<i64: 1, 16, 16>}, {transform_indices = @transform_21, window_bounds = array<i64: 1, 64, 16>}]} {
    %c0 = arith.constant 0 : index
    %c0_0 = arith.constant 0 : index
    %c0_1 = arith.constant 0 : index
    %0 = vector.load %arg1[%c0, %c0_0, %c0_1] : memref<1x16x32xf32, #tpu.memory_space<vmem>>, vector<1x16x32xf32>
    %1 = vector.shape_cast %0 : vector<1x16x32xf32> to vector<16x32xf32>
    %c0_2 = arith.constant 0 : index
    %c0_3 = arith.constant 0 : index
    %c0_4 = arith.constant 0 : index
    %2 = vector.load %arg2[%c0_2, %c0_3, %c0_4] : memref<1x16x16xf32, #tpu.memory_space<vmem>>, vector<1x16x16xf32>
    %3 = tpu.iota {dimensions = array<i32: 0>} : vector<16x16xi32>
    %4 = tpu.iota {dimensions = array<i32: 1>} : vector<16x16xi32>
    %5 = arith.cmpi eq, %3, %4 : vector<16x16xi32>
    %c1_i32 = arith.constant 1 : i32
    %6 = vector.broadcast %c1_i32 : i32 to vector<16x16xi32>
    %7 = arith.addi %3, %6 : vector<16x16xi32>
    %8 = arith.cmpi eq, %4, %7 : vector<16x16xi32>
    %9 = arith.ori %5, %8 : vector<16x16xi1>
    %c1_i32_5 = arith.constant 1 : i32
    %10 = vector.broadcast %c1_i32_5 : i32 to vector<16x16xi32>
    %11 = arith.subi %3, %10 : vector<16x16xi32>
    %12 = arith.cmpi eq, %4, %11 : vector<16x16xi32>
    %13 = arith.ori %9, %12 : vector<16x16xi1>
    %14 = arith.cmpi slt, %3, %4 : vector<16x16xi32>
    %15 = arith.extui %14 : vector<16x16xi1> to vector<16x16xi32>
    %16 = arith.sitofp %15 : vector<16x16xi32> to vector<16x16xf32>
    %cst = arith.constant dense<0.000000e+00> : vector<16xf32>
    %17 = vector.multi_reduction <add>, %1, %cst [1] : vector<16x32xf32> to vector<16xf32>
    %18 = vector.shape_cast %17 : vector<16xf32> to vector<16x1xf32>
    %cst_6 = arith.constant 3.200000e+01 : f32
    %19 = vector.broadcast %cst_6 : f32 to vector<16x1xf32>
    %20 = arith.divf %18, %19 : vector<16x1xf32>
    %21 = vector.broadcast %20 : vector<16x1xf32> to vector<16x32xf32>
    %22 = arith.subf %1, %21 : vector<16x32xf32>
    %23 = arith.mulf %22, %22 : vector<16x32xf32>
    %cst_7 = arith.constant dense<0.000000e+00> : vector<16xf32>
    %24 = vector.multi_reduction <add>, %23, %cst_7 [1] : vector<16x32xf32> to vector<16xf32>
    %25 = vector.shape_cast %24 : vector<16xf32> to vector<16x1xf32>
    %cst_8 = arith.constant 3.200000e+01 : f32
    %26 = vector.broadcast %cst_8 : f32 to vector<16x1xf32>
    %27 = arith.divf %25, %26 : vector<16x1xf32>
    %28 = vector.broadcast %20 : vector<16x1xf32> to vector<16x32xf32>
    %29 = arith.subf %1, %28 : vector<16x32xf32>
    %cst_9 = arith.constant 9.99999974E-6 : f32
    %30 = vector.broadcast %cst_9 : f32 to vector<16x1xf32>
    %31 = arith.addf %27, %30 : vector<16x1xf32>
    %32 = math.rsqrt %31 : vector<16x1xf32>
    %33 = vector.broadcast %32 : vector<16x1xf32> to vector<16x32xf32>
    %34 = arith.mulf %29, %33 : vector<16x32xf32>
    %c0_10 = arith.constant 0 : index
    %c0_11 = arith.constant 0 : index
    %35 = vector.load %arg3[%c0_10, %c0_11] : memref<1x32xf32, #tpu.memory_space<vmem>>, vector<1x32xf32>
    %36 = vector.broadcast %35 : vector<1x32xf32> to vector<16x32xf32>
    %37 = arith.mulf %34, %36 : vector<16x32xf32>
    %c0_12 = arith.constant 0 : index
    %c0_13 = arith.constant 0 : index
    %38 = vector.load %arg4[%c0_12, %c0_13] : memref<1x32xf32, #tpu.memory_space<vmem>>, vector<1x32xf32>
    %39 = vector.broadcast %38 : vector<1x32xf32> to vector<16x32xf32>
    %40 = arith.addf %37, %39 : vector<16x32xf32>
    %c0_14 = arith.constant 0 : index
    %c0_15 = arith.constant 0 : index
    %41 = vector.load %arg5[%c0_14, %c0_15] : memref<1x32xf32, #tpu.memory_space<vmem>>, vector<1x32xf32>
    %42 = vector.broadcast %41 : vector<1x32xf32> to vector<16x32xf32>
    %43 = arith.mulf %34, %42 : vector<16x32xf32>
    %c0_16 = arith.constant 0 : index
    %c0_17 = arith.constant 0 : index
    %44 = vector.load %arg6[%c0_16, %c0_17] : memref<1x32xf32, #tpu.memory_space<vmem>>, vector<1x32xf32>
    %45 = vector.broadcast %44 : vector<1x32xf32> to vector<16x32xf32>
    %46 = arith.addf %43, %45 : vector<16x32xf32>
    %c0_18 = arith.constant 0 : index
    %c0_19 = arith.constant 0 : index
    %47 = vector.load %arg7[%c0_18, %c0_19] : memref<32x64xf32, #tpu.memory_space<vmem>>, vector<32x64xf32>
    %cst_20 = arith.constant dense<0.000000e+00> : vector<16x64xf32>
    %48 = tpu.matmul %40, %47, %cst_20 {dimension_numbers = #tpu.dot_dimension_numbers<[1], [0], [0], [1], [0, 0, 1, 1], [], []>, precision = #tpu.contract_precision<fp32>} : vector<16x32xf32>, vector<32x64xf32>, vector<16x64xf32> -> vector<16x64xf32>
    %c0_21 = arith.constant 0 : index
    %c0_22 = arith.constant 0 : index
    %49 = vector.load %arg8[%c0_21, %c0_22] : memref<1x64xf32, #tpu.memory_space<vmem>>, vector<1x64xf32>
    %50 = vector.broadcast %49 : vector<1x64xf32> to vector<16x64xf32>
    %51 = arith.addf %48, %50 : vector<16x64xf32>
    %52 = vector.extract_strided_slice %51 {offsets = [0, 0], sizes = [16, 32], strides = [1, 1]} : vector<16x64xf32> to vector<16x32xf32>
    %53 = vector.shape_cast %52 : vector<16x32xf32> to vector<1x16x32xf32>
    %54 = vector.extract_strided_slice %51 {offsets = [0, 32], sizes = [16, 32], strides = [1, 1]} : vector<16x64xf32> to vector<16x32xf32>
    %55 = vector.shape_cast %54 : vector<16x32xf32> to vector<1x16x32xf32>
    "tpu.trace_start"() <{level = 10 : i32, message = "bqd,bkd->bqk"}> : () -> ()
    %cst_23 = arith.constant dense<0.000000e+00> : vector<1x16x16xf32>
    %56 = tpu.matmul %53, %55, %cst_23 {dimension_numbers = #tpu.dot_dimension_numbers<[2], [2], [1], [1], [0, 0, 0, 1, 1, 1], [0], [0]>, precision = #tpu.contract_precision<fp32>} : vector<1x16x32xf32>, vector<1x16x32xf32>, vector<1x16x16xf32> -> vector<1x16x16xf32>
    %cst_24 = arith.constant -1.000000e+09 : f32
    "tpu.trace_stop"() : () -> ()
    %57 = vector.shape_cast %13 : vector<16x16xi1> to vector<1x16x16xi1>
    %58 = vector.broadcast %cst_24 : f32 to vector<1x16x16xf32>
    %59 = arith.select %57, %56, %58 : vector<1x16x16xi1>, vector<1x16x16xf32>
    %cst_25 = arith.constant dense<0xFF800000> : vector<1x16xf32>
    %60 = vector.multi_reduction <maximumf>, %59, %cst_25 [2] : vector<1x16x16xf32> to vector<1x16xf32>
    %61 = vector.shape_cast %60 : vector<1x16xf32> to vector<1x16x1xf32>
    %62 = vector.broadcast %61 : vector<1x16x1xf32> to vector<1x16x16xf32>
    %63 = arith.subf %59, %62 : vector<1x16x16xf32>
    %64 = math.exp %63 : vector<1x16x16xf32>
    %cst_26 = arith.constant dense<0.000000e+00> : vector<1x16xf32>
    %65 = vector.multi_reduction <add>, %64, %cst_26 [2] : vector<1x16x16xf32> to vector<1x16xf32>
    %66 = vector.shape_cast %65 : vector<1x16xf32> to vector<1x16x1xf32>
    %67 = vector.broadcast %66 : vector<1x16x1xf32> to vector<1x16x16xf32>
    %68 = arith.divf %64, %67 : vector<1x16x16xf32>
    %69 = vector.shape_cast %68 : vector<1x16x16xf32> to vector<16x16xf32>
    %70 = tpu.transpose %69, [1, 0] : vector<16x16xf32> -> vector<16x16xf32>
    %71 = vector.shape_cast %70 : vector<16x16xf32> to vector<1x16x16xf32>
    %72 = arith.mulf %68, %71 : vector<1x16x16xf32>
    %cst_27 = arith.constant 9.99999971E-10 : f32
    %73 = vector.broadcast %cst_27 : f32 to vector<1x16x16xf32>
    %74 = arith.addf %72, %73 : vector<1x16x16xf32>
    %75 = math.sqrt %74 : vector<1x16x16xf32>
    %cst_28 = arith.constant 1.000000e+00 : f32
    %76 = vector.broadcast %cst_28 : f32 to vector<1x16x16xf32>
    %77 = arith.subf %76, %2 : vector<1x16x16xf32>
    %78 = arith.mulf %77, %75 : vector<1x16x16xf32>
    %79 = arith.addf %2, %78 : vector<1x16x16xf32>
    %cst_29 = arith.constant 0.000000e+00 : f32
    %80 = vector.shape_cast %8 : vector<16x16xi1> to vector<1x16x16xi1>
    %81 = vector.broadcast %cst_29 : f32 to vector<1x16x16xf32>
    %82 = arith.select %80, %79, %81 : vector<1x16x16xi1>, vector<1x16x16xf32>
    %cst_30 = arith.constant dense<0.000000e+00> : vector<1x16xf32>
    %83 = vector.multi_reduction <add>, %82, %cst_30 [2] : vector<1x16x16xf32> to vector<1x16xf32>
    %cst_31 = arith.constant 9.99999971E-10 : f32
    %84 = vector.broadcast %cst_31 : f32 to vector<1x16xf32>
    %85 = arith.addf %83, %84 : vector<1x16xf32>
    %86 = math.log %85 : vector<1x16xf32>
    %cst_32 = arith.constant dense<0.000000e+00> : vector<1x16xf32>
    %87 = tpu.matmul %86, %16, %cst_32 {dimension_numbers = #tpu.dot_dimension_numbers<[1], [0], [0], [1], [0, 0, 1, 1], [], []>, precision = #tpu.contract_precision<fp32>} : vector<1x16xf32>, vector<16x16xf32>, vector<1x16xf32> -> vector<1x16xf32>
    %88 = vector.shape_cast %87 : vector<1x16xf32> to vector<1x1x16xf32>
    %89 = vector.shape_cast %87 : vector<1x16xf32> to vector<1x16x1xf32>
    %90 = vector.broadcast %88 : vector<1x1x16xf32> to vector<1x16x16xf32>
    %91 = vector.broadcast %89 : vector<1x16x1xf32> to vector<1x16x16xf32>
    %92 = arith.subf %90, %91 : vector<1x16x16xf32>
    %93 = arith.cmpi sgt, %4, %3 : vector<16x16xi32>
    %cst_33 = arith.constant 0.000000e+00 : f32
    %94 = vector.broadcast %cst_33 : f32 to vector<1x16x16xf32>
    %95 = arith.subf %94, %92 : vector<1x16x16xf32>
    %96 = vector.shape_cast %93 : vector<16x16xi1> to vector<1x16x16xi1>
    %97 = arith.select %96, %92, %95 : vector<1x16x16xi1>, vector<1x16x16xf32>
    %98 = math.exp %97 : vector<1x16x16xf32>
    %cst_34 = arith.constant 9.99999971E-10 : f32
    %99 = vector.broadcast %cst_34 : f32 to vector<1x16x16xf32>
    %100 = arith.addf %98, %99 : vector<1x16x16xf32>
    %101 = vector.shape_cast %5 : vector<16x16xi1> to vector<1x16x16xi1>
    %102 = arith.select %101, %79, %100 : vector<1x16x16xi1>, vector<1x16x16xf32>
    %c0_35 = arith.constant 0 : index
    %c0_36 = arith.constant 0 : index
    %c0_37 = arith.constant 0 : index
    %103 = vector.load %arg20[%c0_35, %c0_36, %c0_37] : memref<1x16x16xf32, #tpu.memory_space<vmem>>, vector<1x16x16xf32>
    tpu.vector_store %arg20[%c0_35, %c0_36, %c0_37], %102 {strides = array<i32>} : memref<1x16x16xf32, #tpu.memory_space<vmem>>, vector<1x16x16xf32>,
    %c0_38 = arith.constant 0 : index
    %c0_39 = arith.constant 0 : index
    %c0_40 = arith.constant 0 : index
    %104 = vector.load %arg21[%c0_38, %c0_39, %c0_40] : memref<1x16x16xf32, #tpu.memory_space<vmem>>, vector<1x16x16xf32>
    tpu.vector_store %arg21[%c0_38, %c0_39, %c0_40], %79 {strides = array<i32>} : memref<1x16x16xf32, #tpu.memory_space<vmem>>, vector<1x16x16xf32>,
    %c0_41 = arith.constant 0 : index
    %c0_42 = arith.constant 0 : index
    %105 = vector.load %arg9[%c0_41, %c0_42] : memref<32x96xbf16, #tpu.memory_space<vmem>>, vector<32x96xbf16>
    %106 = arith.truncf %46 : vector<16x32xf32> to vector<16x32xbf16>
    %cst_43 = arith.constant dense<0.000000e+00> : vector<16x96xf32>
    %107 = tpu.matmul %106, %105, %cst_43 {dimension_numbers = #tpu.dot_dimension_numbers<[1], [0], [0], [1], [0, 0, 1, 1], [], []>} : vector<16x32xbf16>, vector<32x96xbf16>, vector<16x96xf32> -> vector<16x96xf32>
    %c0_44 = arith.constant 0 : index
    %c0_45 = arith.constant 0 : index
    %108 = vector.load %arg10[%c0_44, %c0_45] : memref<1x96xf32, #tpu.memory_space<vmem>>, vector<1x96xf32>
    %109 = vector.broadcast %108 : vector<1x96xf32> to vector<16x96xf32>
    %110 = arith.addf %107, %109 : vector<16x96xf32>
    %111 = vector.extract_strided_slice %110 {offsets = [0, 0], sizes = [16, 32], strides = [1, 1]} : vector<16x96xf32> to vector<16x32xf32>
    %112 = vector.shape_cast %111 : vector<16x32xf32> to vector<1x16x32xf32>
    %113 = vector.extract_strided_slice %110 {offsets = [0, 32], sizes = [16, 32], strides = [1, 1]} : vector<16x96xf32> to vector<16x32xf32>
    %114 = vector.shape_cast %113 : vector<16x32xf32> to vector<1x16x32xf32>
    %115 = vector.extract_strided_slice %110 {offsets = [0, 64], sizes = [16, 32], strides = [1, 1]} : vector<16x96xf32> to vector<16x32xf32>
    %116 = vector.shape_cast %115 : vector<16x32xf32> to vector<1x16x32xf32>
    %117 = vector.extract_strided_slice %112 {offsets = [0, 0, 0], sizes = [1, 16, 8], strides = [1, 1, 1]} : vector<1x16x32xf32> to vector<1x16x8xf32>
    %118 = arith.truncf %117 : vector<1x16x8xf32> to vector<1x16x8xbf16>
    %119 = vector.extract_strided_slice %114 {offsets = [0, 0, 0], sizes = [1, 16, 8], strides = [1, 1, 1]} : vector<1x16x32xf32> to vector<1x16x8xf32>
    %120 = arith.truncf %119 : vector<1x16x8xf32> to vector<1x16x8xbf16>
    %121 = vector.extract_strided_slice %116 {offsets = [0, 0, 0], sizes = [1, 16, 8], strides = [1, 1, 1]} : vector<1x16x32xf32> to vector<1x16x8xf32>
    %122 = arith.truncf %121 : vector<1x16x8xf32> to vector<1x16x8xbf16>
    "tpu.trace_start"() <{level = 10 : i32, message = "bqd,bkd->bqk"}> : () -> ()
    %cst_46 = arith.constant dense<0.000000e+00> : vector<1x16x16xf32>
    %123 = tpu.matmul %118, %120, %cst_46 {dimension_numbers = #tpu.dot_dimension_numbers<[2], [2], [1], [1], [0, 0, 0, 1, 1, 1], [0], [0]>} : vector<1x16x8xbf16>, vector<1x16x8xbf16>, vector<1x16x16xf32> -> vector<1x16x16xf32>
    "tpu.trace_stop"() : () -> ()
    %cst_47 = arith.constant dense<0xFF800000> : vector<1x16xf32>
    %124 = vector.multi_reduction <maximumf>, %123, %cst_47 [2] : vector<1x16x16xf32> to vector<1x16xf32>
    %125 = vector.shape_cast %124 : vector<1x16xf32> to vector<1x16x1xf32>
    %126 = vector.broadcast %125 : vector<1x16x1xf32> to vector<1x16x16xf32>
    %127 = arith.subf %123, %126 : vector<1x16x16xf32>
    %128 = math.exp %127 : vector<1x16x16xf32>
    %cst_48 = arith.constant dense<0.000000e+00> : vector<1x16xf32>
    %129 = vector.multi_reduction <add>, %128, %cst_48 [2] : vector<1x16x16xf32> to vector<1x16xf32>
    %130 = vector.shape_cast %129 : vector<1x16xf32> to vector<1x16x1xf32>
    %131 = tpu.reciprocal %130 {approx = true} : vector<1x16x1xf32> -> vector<1x16x1xf32>
    %132 = vector.broadcast %131 : vector<1x16x1xf32> to vector<1x16x16xf32>
    %133 = arith.mulf %128, %132 : vector<1x16x16xf32>
    %134 = arith.mulf %133, %102 : vector<1x16x16xf32>
    %135 = arith.truncf %134 : vector<1x16x16xf32> to vector<1x16x16xbf16>
    %c0_49 = arith.constant 0 : index
    %c0_50 = arith.constant 0 : index
    %c0_51 = arith.constant 0 : index
    %136 = vector.load %arg22[%c0_49, %c0_50, %c0_51] : memref<1x64x16xbf16, #tpu.memory_space<vmem>>, vector<1x16x16xbf16>
    tpu.vector_store %arg22[%c0_49, %c0_50, %c0_51], %135 {strides = array<i32>} : memref<1x64x16xbf16, #tpu.memory_space<vmem>>, vector<1x16x16xbf16>,
    %137 = arith.truncf %134 : vector<1x16x16xf32> to vector<1x16x16xbf16>
    "tpu.trace_start"() <{level = 10 : i32, message = "bqk,bkd->bqd"}> : () -> ()
    %cst_52 = arith.constant dense<0.000000e+00> : vector<1x16x8xf32>
    %138 = tpu.matmul %137, %122, %cst_52 {dimension_numbers = #tpu.dot_dimension_numbers<[2], [1], [1], [2], [0, 0, 0, 1, 1, 2], [0], [0]>} : vector<1x16x16xbf16>, vector<1x16x8xbf16>, vector<1x16x8xf32> -> vector<1x16x8xf32>
    "tpu.trace_stop"() : () -> ()
    %139 = vector.shape_cast %138 : vector<1x16x8xf32> to vector<16x8xf32>
    %140 = arith.truncf %139 : vector<16x8xf32> to vector<16x8xbf16>
    %c0_53 = arith.constant 0 : index
    %c0_54 = arith.constant 0 : index
    %141 = vector.load %arg11[%c0_53, %c0_54] : memref<32x32xbf16, #tpu.memory_space<vmem>>, vector<32x8xbf16>
    "tpu.trace_start"() <{level = 10 : i32, message = "nd,od->no"}> : () -> ()
    %cst_55 = arith.constant dense<0.000000e+00> : vector<16x32xf32>
    %142 = tpu.matmul %140, %141, %cst_55 {dimension_numbers = #tpu.dot_dimension_numbers<[1], [1], [0], [0], [0, 0, 1, 0], [], []>} : vector<16x8xbf16>, vector<32x8xbf16>, vector<16x32xf32> -> vector<16x32xf32>
    "tpu.trace_stop"() : () -> ()
    %143 = vector.extract_strided_slice %112 {offsets = [0, 0, 8], sizes = [1, 16, 8], strides = [1, 1, 1]} : vector<1x16x32xf32> to vector<1x16x8xf32>
    %144 = arith.truncf %143 : vector<1x16x8xf32> to vector<1x16x8xbf16>
    %145 = vector.extract_strided_slice %114 {offsets = [0, 0, 8], sizes = [1, 16, 8], strides = [1, 1, 1]} : vector<1x16x32xf32> to vector<1x16x8xf32>
    %146 = arith.truncf %145 : vector<1x16x8xf32> to vector<1x16x8xbf16>
    %147 = vector.extract_strided_slice %116 {offsets = [0, 0, 8], sizes = [1, 16, 8], strides = [1, 1, 1]} : vector<1x16x32xf32> to vector<1x16x8xf32>
    %148 = arith.truncf %147 : vector<1x16x8xf32> to vector<1x16x8xbf16>
    "tpu.trace_start"() <{level = 10 : i32, message = "bqd,bkd->bqk"}> : () -> ()
    %cst_56 = arith.constant dense<0.000000e+00> : vector<1x16x16xf32>
    %149 = tpu.matmul %144, %146, %cst_56 {dimension_numbers = #tpu.dot_dimension_numbers<[2], [2], [1], [1], [0, 0, 0, 1, 1, 1], [0], [0]>} : vector<1x16x8xbf16>, vector<1x16x8xbf16>, vector<1x16x16xf32> -> vector<1x16x16xf32>
    "tpu.trace_stop"() : () -> ()
    %cst_57 = arith.constant dense<0xFF800000> : vector<1x16xf32>
    %150 = vector.multi_reduction <maximumf>, %149, %cst_57 [2] : vector<1x16x16xf32> to vector<1x16xf32>
    %151 = vector.shape_cast %150 : vector<1x16xf32> to vector<1x16x1xf32>
    %152 = vector.broadcast %151 : vector<1x16x1xf32> to vector<1x16x16xf32>
    %153 = arith.subf %149, %152 : vector<1x16x16xf32>
    %154 = math.exp %153 : vector<1x16x16xf32>
    %cst_58 = arith.constant dense<0.000000e+00> : vector<1x16xf32>
    %155 = vector.multi_reduction <add>, %154, %cst_58 [2] : vector<1x16x16xf32> to vector<1x16xf32>
    %156 = vector.shape_cast %155 : vector<1x16xf32> to vector<1x16x1xf32>
    %157 = tpu.reciprocal %156 {approx = true} : vector<1x16x1xf32> -> vector<1x16x1xf32>
    %158 = vector.broadcast %157 : vector<1x16x1xf32> to vector<1x16x16xf32>
    %159 = arith.mulf %154, %158 : vector<1x16x16xf32>
    %160 = arith.mulf %159, %102 : vector<1x16x16xf32>
    %161 = arith.truncf %160 : vector<1x16x16xf32> to vector<1x16x16xbf16>
    %c0_59 = arith.constant 0 : index
    %c16 = arith.constant 16 : index
    %c0_60 = arith.constant 0 : index
    %162 = vector.load %arg22[%c0_59, %c16, %c0_60] : memref<1x64x16xbf16, #tpu.memory_space<vmem>>, vector<1x16x16xbf16>
    tpu.vector_store %arg22[%c0_59, %c16, %c0_60], %161 {strides = array<i32>} : memref<1x64x16xbf16, #tpu.memory_space<vmem>>, vector<1x16x16xbf16>,
    %163 = arith.truncf %160 : vector<1x16x16xf32> to vector<1x16x16xbf16>
    "tpu.trace_start"() <{level = 10 : i32, message = "bqk,bkd->bqd"}> : () -> ()
    %cst_61 = arith.constant dense<0.000000e+00> : vector<1x16x8xf32>
    %164 = tpu.matmul %163, %148, %cst_61 {dimension_numbers = #tpu.dot_dimension_numbers<[2], [1], [1], [2], [0, 0, 0, 1, 1, 2], [0], [0]>} : vector<1x16x16xbf16>, vector<1x16x8xbf16>, vector<1x16x8xf32> -> vector<1x16x8xf32>
    "tpu.trace_stop"() : () -> ()
    %165 = vector.shape_cast %164 : vector<1x16x8xf32> to vector<16x8xf32>
    %166 = arith.truncf %165 : vector<16x8xf32> to vector<16x8xbf16>
    %c0_62 = arith.constant 0 : index
    %c8 = arith.constant 8 : index
    %167 = vector.load %arg11[%c0_62, %c8] : memref<32x32xbf16, #tpu.memory_space<vmem>>, vector<32x8xbf16>
    "tpu.trace_start"() <{level = 10 : i32, message = "nd,od->no"}> : () -> ()
    %cst_63 = arith.constant dense<0.000000e+00> : vector<16x32xf32>
    %168 = tpu.matmul %166, %167, %cst_63 {dimension_numbers = #tpu.dot_dimension_numbers<[1], [1], [0], [0], [0, 0, 1, 0], [], []>} : vector<16x8xbf16>, vector<32x8xbf16>, vector<16x32xf32> -> vector<16x32xf32>
    "tpu.trace_stop"() : () -> ()
    %169 = arith.addf %142, %168 : vector<16x32xf32>
    %170 = vector.extract_strided_slice %112 {offsets = [0, 0, 16], sizes = [1, 16, 8], strides = [1, 1, 1]} : vector<1x16x32xf32> to vector<1x16x8xf32>
    %171 = arith.truncf %170 : vector<1x16x8xf32> to vector<1x16x8xbf16>
    %172 = vector.extract_strided_slice %114 {offsets = [0, 0, 16], sizes = [1, 16, 8], strides = [1, 1, 1]} : vector<1x16x32xf32> to vector<1x16x8xf32>
    %173 = arith.truncf %172 : vector<1x16x8xf32> to vector<1x16x8xbf16>
    %174 = vector.extract_strided_slice %116 {offsets = [0, 0, 16], sizes = [1, 16, 8], strides = [1, 1, 1]} : vector<1x16x32xf32> to vector<1x16x8xf32>
    %175 = arith.truncf %174 : vector<1x16x8xf32> to vector<1x16x8xbf16>
    "tpu.trace_start"() <{level = 10 : i32, message = "bqd,bkd->bqk"}> : () -> ()
    %cst_64 = arith.constant dense<0.000000e+00> : vector<1x16x16xf32>
    %176 = tpu.matmul %171, %173, %cst_64 {dimension_numbers = #tpu.dot_dimension_numbers<[2], [2], [1], [1], [0, 0, 0, 1, 1, 1], [0], [0]>} : vector<1x16x8xbf16>, vector<1x16x8xbf16>, vector<1x16x16xf32> -> vector<1x16x16xf32>
    "tpu.trace_stop"() : () -> ()
    %cst_65 = arith.constant dense<0xFF800000> : vector<1x16xf32>
    %177 = vector.multi_reduction <maximumf>, %176, %cst_65 [2] : vector<1x16x16xf32> to vector<1x16xf32>
    %178 = vector.shape_cast %177 : vector<1x16xf32> to vector<1x16x1xf32>
    %179 = vector.broadcast %178 : vector<1x16x1xf32> to vector<1x16x16xf32>
    %180 = arith.subf %176, %179 : vector<1x16x16xf32>
    %181 = math.exp %180 : vector<1x16x16xf32>
    %cst_66 = arith.constant dense<0.000000e+00> : vector<1x16xf32>
    %182 = vector.multi_reduction <add>, %181, %cst_66 [2] : vector<1x16x16xf32> to vector<1x16xf32>
    %183 = vector.shape_cast %182 : vector<1x16xf32> to vector<1x16x1xf32>
    %184 = tpu.reciprocal %183 {approx = true} : vector<1x16x1xf32> -> vector<1x16x1xf32>
    %185 = vector.broadcast %184 : vector<1x16x1xf32> to vector<1x16x16xf32>
    %186 = arith.mulf %181, %185 : vector<1x16x16xf32>
    %187 = arith.mulf %186, %102 : vector<1x16x16xf32>
    %188 = arith.truncf %187 : vector<1x16x16xf32> to vector<1x16x16xbf16>
    %c0_67 = arith.constant 0 : index
    %c32 = arith.constant 32 : index
    %c0_68 = arith.constant 0 : index
    %189 = vector.load %arg22[%c0_67, %c32, %c0_68] : memref<1x64x16xbf16, #tpu.memory_space<vmem>>, vector<1x16x16xbf16>
    tpu.vector_store %arg22[%c0_67, %c32, %c0_68], %188 {strides = array<i32>} : memref<1x64x16xbf16, #tpu.memory_space<vmem>>, vector<1x16x16xbf16>,
    %190 = arith.truncf %187 : vector<1x16x16xf32> to vector<1x16x16xbf16>
    "tpu.trace_start"() <{level = 10 : i32, message = "bqk,bkd->bqd"}> : () -> ()
    %cst_69 = arith.constant dense<0.000000e+00> : vector<1x16x8xf32>
    %191 = tpu.matmul %190, %175, %cst_69 {dimension_numbers = #tpu.dot_dimension_numbers<[2], [1], [1], [2], [0, 0, 0, 1, 1, 2], [0], [0]>} : vector<1x16x16xbf16>, vector<1x16x8xbf16>, vector<1x16x8xf32> -> vector<1x16x8xf32>
    "tpu.trace_stop"() : () -> ()
    %192 = vector.shape_cast %191 : vector<1x16x8xf32> to vector<16x8xf32>
    %193 = arith.truncf %192 : vector<16x8xf32> to vector<16x8xbf16>
    %c0_70 = arith.constant 0 : index
    %c16_71 = arith.constant 16 : index
    %194 = vector.load %arg11[%c0_70, %c16_71] : memref<32x32xbf16, #tpu.memory_space<vmem>>, vector<32x8xbf16>
    "tpu.trace_start"() <{level = 10 : i32, message = "nd,od->no"}> : () -> ()
    %cst_72 = arith.constant dense<0.000000e+00> : vector<16x32xf32>
    %195 = tpu.matmul %193, %194, %cst_72 {dimension_numbers = #tpu.dot_dimension_numbers<[1], [1], [0], [0], [0, 0, 1, 0], [], []>} : vector<16x8xbf16>, vector<32x8xbf16>, vector<16x32xf32> -> vector<16x32xf32>
    "tpu.trace_stop"() : () -> ()
    %196 = arith.addf %169, %195 : vector<16x32xf32>
    %197 = vector.extract_strided_slice %112 {offsets = [0, 0, 24], sizes = [1, 16, 8], strides = [1, 1, 1]} : vector<1x16x32xf32> to vector<1x16x8xf32>
    %198 = arith.truncf %197 : vector<1x16x8xf32> to vector<1x16x8xbf16>
    %199 = vector.extract_strided_slice %114 {offsets = [0, 0, 24], sizes = [1, 16, 8], strides = [1, 1, 1]} : vector<1x16x32xf32> to vector<1x16x8xf32>
    %200 = arith.truncf %199 : vector<1x16x8xf32> to vector<1x16x8xbf16>
    %201 = vector.extract_strided_slice %116 {offsets = [0, 0, 24], sizes = [1, 16, 8], strides = [1, 1, 1]} : vector<1x16x32xf32> to vector<1x16x8xf32>
    %202 = arith.truncf %201 : vector<1x16x8xf32> to vector<1x16x8xbf16>
    "tpu.trace_start"() <{level = 10 : i32, message = "bqd,bkd->bqk"}> : () -> ()
    %cst_73 = arith.constant dense<0.000000e+00> : vector<1x16x16xf32>
    %203 = tpu.matmul %198, %200, %cst_73 {dimension_numbers = #tpu.dot_dimension_numbers<[2], [2], [1], [1], [0, 0, 0, 1, 1, 1], [0], [0]>} : vector<1x16x8xbf16>, vector<1x16x8xbf16>, vector<1x16x16xf32> -> vector<1x16x16xf32>
    "tpu.trace_stop"() : () -> ()
    %cst_74 = arith.constant dense<0xFF800000> : vector<1x16xf32>
    %204 = vector.multi_reduction <maximumf>, %203, %cst_74 [2] : vector<1x16x16xf32> to vector<1x16xf32>
    %205 = vector.shape_cast %204 : vector<1x16xf32> to vector<1x16x1xf32>
    %206 = vector.broadcast %205 : vector<1x16x1xf32> to vector<1x16x16xf32>
    %207 = arith.subf %203, %206 : vector<1x16x16xf32>
    %208 = math.exp %207 : vector<1x16x16xf32>
    %cst_75 = arith.constant dense<0.000000e+00> : vector<1x16xf32>
    %209 = vector.multi_reduction <add>, %208, %cst_75 [2] : vector<1x16x16xf32> to vector<1x16xf32>
    %210 = vector.shape_cast %209 : vector<1x16xf32> to vector<1x16x1xf32>
    %211 = tpu.reciprocal %210 {approx = true} : vector<1x16x1xf32> -> vector<1x16x1xf32>
    %212 = vector.broadcast %211 : vector<1x16x1xf32> to vector<1x16x16xf32>
    %213 = arith.mulf %208, %212 : vector<1x16x16xf32>
    %214 = arith.mulf %213, %102 : vector<1x16x16xf32>
    %215 = arith.truncf %214 : vector<1x16x16xf32> to vector<1x16x16xbf16>
    %c0_76 = arith.constant 0 : index
    %c48 = arith.constant 48 : index
    %c0_77 = arith.constant 0 : index
    %216 = vector.load %arg22[%c0_76, %c48, %c0_77] : memref<1x64x16xbf16, #tpu.memory_space<vmem>>, vector<1x16x16xbf16>
    tpu.vector_store %arg22[%c0_76, %c48, %c0_77], %215 {strides = array<i32>} : memref<1x64x16xbf16, #tpu.memory_space<vmem>>, vector<1x16x16xbf16>,
    %217 = arith.truncf %214 : vector<1x16x16xf32> to vector<1x16x16xbf16>
    "tpu.trace_start"() <{level = 10 : i32, message = "bqk,bkd->bqd"}> : () -> ()
    %cst_78 = arith.constant dense<0.000000e+00> : vector<1x16x8xf32>
    %218 = tpu.matmul %217, %202, %cst_78 {dimension_numbers = #tpu.dot_dimension_numbers<[2], [1], [1], [2], [0, 0, 0, 1, 1, 2], [0], [0]>} : vector<1x16x16xbf16>, vector<1x16x8xbf16>, vector<1x16x8xf32> -> vector<1x16x8xf32>
    "tpu.trace_stop"() : () -> ()
    %219 = vector.shape_cast %218 : vector<1x16x8xf32> to vector<16x8xf32>
    %220 = arith.truncf %219 : vector<16x8xf32> to vector<16x8xbf16>
    %c0_79 = arith.constant 0 : index
    %c24 = arith.constant 24 : index
    %221 = vector.load %arg11[%c0_79, %c24] : memref<32x32xbf16, #tpu.memory_space<vmem>>, vector<32x8xbf16>
    "tpu.trace_start"() <{level = 10 : i32, message = "nd,od->no"}> : () -> ()
    %cst_80 = arith.constant dense<0.000000e+00> : vector<16x32xf32>
    %222 = tpu.matmul %220, %221, %cst_80 {dimension_numbers = #tpu.dot_dimension_numbers<[1], [1], [0], [0], [0, 0, 1, 0], [], []>} : vector<16x8xbf16>, vector<32x8xbf16>, vector<16x32xf32> -> vector<16x32xf32>
    "tpu.trace_stop"() : () -> ()
    %223 = arith.addf %196, %222 : vector<16x32xf32>
    %224 = arith.addf %1, %223 : vector<16x32xf32>
    %c0_81 = arith.constant 0 : index
    %c0_82 = arith.constant 0 : index
    %225 = vector.load %arg12[%c0_81, %c0_82] : memref<1x32xf32, #tpu.memory_space<vmem>>, vector<1x32xf32>
    %226 = vector.broadcast %225 : vector<1x32xf32> to vector<16x32xf32>
    %227 = arith.addf %224, %226 : vector<16x32xf32>
    %c0_83 = arith.constant 0 : index
    %c0_84 = arith.constant 0 : index
    %228 = vector.load %arg13[%c0_83, %c0_84] : memref<1x32xf32, #tpu.memory_space<vmem>>, vector<1x32xf32>
    %c0_85 = arith.constant 0 : index
    %c0_86 = arith.constant 0 : index
    %229 = vector.load %arg14[%c0_85, %c0_86] : memref<1x32xf32, #tpu.memory_space<vmem>>, vector<1x32xf32>
    %cst_87 = arith.constant dense<0.000000e+00> : vector<16xf32>
    %230 = vector.multi_reduction <add>, %227, %cst_87 [1] : vector<16x32xf32> to vector<16xf32>
    %231 = vector.shape_cast %230 : vector<16xf32> to vector<16x1xf32>
    %cst_88 = arith.constant 3.200000e+01 : f32
    %232 = vector.broadcast %cst_88 : f32 to vector<16x1xf32>
    %233 = arith.divf %231, %232 : vector<16x1xf32>
    %234 = vector.broadcast %233 : vector<16x1xf32> to vector<16x32xf32>
    %235 = arith.subf %227, %234 : vector<16x32xf32>
    %236 = arith.mulf %235, %235 : vector<16x32xf32>
    %cst_89 = arith.constant dense<0.000000e+00> : vector<16xf32>
    %237 = vector.multi_reduction <add>, %236, %cst_89 [1] : vector<16x32xf32> to vector<16xf32>
    %238 = vector.shape_cast %237 : vector<16xf32> to vector<16x1xf32>
    %cst_90 = arith.constant 3.200000e+01 : f32
    %239 = vector.broadcast %cst_90 : f32 to vector<16x1xf32>
    %240 = arith.divf %238, %239 : vector<16x1xf32>
    %241 = vector.broadcast %233 : vector<16x1xf32> to vector<16x32xf32>
    %242 = arith.subf %227, %241 : vector<16x32xf32>
    %cst_91 = arith.constant 9.99999974E-6 : f32
    %243 = vector.broadcast %cst_91 : f32 to vector<16x1xf32>
    %244 = arith.addf %240, %243 : vector<16x1xf32>
    %245 = math.rsqrt %244 : vector<16x1xf32>
    %246 = vector.broadcast %245 : vector<16x1xf32> to vector<16x32xf32>
    %247 = arith.mulf %242, %246 : vector<16x32xf32>
    %248 = vector.broadcast %228 : vector<1x32xf32> to vector<16x32xf32>
    %249 = arith.mulf %247, %248 : vector<16x32xf32>
    %250 = vector.broadcast %229 : vector<1x32xf32> to vector<16x32xf32>
    %251 = arith.addf %249, %250 : vector<16x32xf32>
    %c0_92 = arith.constant 0 : index
    %c0_93 = arith.constant 0 : index
    %252 = vector.load %arg15[%c0_92, %c0_93] : memref<32x64xbf16, #tpu.memory_space<vmem>>, vector<32x64xbf16>
    %253 = arith.truncf %251 : vector<16x32xf32> to vector<16x32xbf16>
    %cst_94 = arith.constant dense<0.000000e+00> : vector<16x64xf32>
    %254 = tpu.matmul %253, %252, %cst_94 {dimension_numbers = #tpu.dot_dimension_numbers<[1], [0], [0], [1], [0, 0, 1, 1], [], []>} : vector<16x32xbf16>, vector<32x64xbf16>, vector<16x64xf32> -> vector<16x64xf32>
    %c0_95 = arith.constant 0 : index
    %c0_96 = arith.constant 0 : index
    %255 = vector.load %arg16[%c0_95, %c0_96] : memref<1x64xf32, #tpu.memory_space<vmem>>, vector<1x64xf32>
    %256 = vector.broadcast %255 : vector<1x64xf32> to vector<16x64xf32>
    %257 = arith.addf %254, %256 : vector<16x64xf32>
    %cst_97 = arith.constant 0.000000e+00 : f32
    %258 = vector.broadcast %cst_97 : f32 to vector<16x64xf32>
    %259 = arith.maximumf %257, %258 : vector<16x64xf32>
    %c0_98 = arith.constant 0 : index
    %c0_99 = arith.constant 0 : index
    %260 = vector.load %arg17[%c0_98, %c0_99] : memref<64x32xbf16, #tpu.memory_space<vmem>>, vector<64x32xbf16>
    %261 = arith.truncf %259 : vector<16x64xf32> to vector<16x64xbf16>
    %cst_100 = arith.constant dense<0.000000e+00> : vector<16x32xf32>
    %262 = tpu.matmul %261, %260, %cst_100 {dimension_numbers = #tpu.dot_dimension_numbers<[1], [0], [0], [1], [0, 0, 1, 1], [], []>} : vector<16x64xbf16>, vector<64x32xbf16>, vector<16x32xf32> -> vector<16x32xf32>
    %263 = arith.addf %227, %262 : vector<16x32xf32>
    %c0_101 = arith.constant 0 : index
    %c0_102 = arith.constant 0 : index
    %264 = vector.load %arg18[%c0_101, %c0_102] : memref<1x32xf32, #tpu.memory_space<vmem>>, vector<1x32xf32>
    %265 = vector.broadcast %264 : vector<1x32xf32> to vector<16x32xf32>
    %266 = arith.addf %263, %265 : vector<16x32xf32>
    %267 = vector.shape_cast %266 : vector<16x32xf32> to vector<1x16x32xf32>
    %c0_103 = arith.constant 0 : index
    %c0_104 = arith.constant 0 : index
    %c0_105 = arith.constant 0 : index
    %268 = vector.load %arg19[%c0_103, %c0_104, %c0_105] : memref<1x16x32xf32, #tpu.memory_space<vmem>>, vector<1x16x32xf32>
    tpu.vector_store %arg19[%c0_103, %c0_104, %c0_105], %267 {strides = array<i32>} : memref<1x16x32xf32, #tpu.memory_space<vmem>>, vector<1x16x32xf32>,
    return
  }
  func.func @transform_0(%arg0: i32) -> (i32, i32, i32) {
    %c0_i32 = arith.constant 0 : i32
    %c0_i32_0 = arith.constant 0 : i32
    %c0_i32_1 = arith.constant 0 : i32
    return %arg0, %c0_i32, %c0_i32_0 : i32, i32, i32
  }
  func.func @transform_1(%arg0: i32) -> (i32, i32, i32) {
    %c0_i32 = arith.constant 0 : i32
    %c0_i32_0 = arith.constant 0 : i32
    %c0_i32_1 = arith.constant 0 : i32
    return %arg0, %c0_i32, %c0_i32_0 : i32, i32, i32
  }
  func.func @transform_2(%arg0: i32) -> (i32, i32) {
    %c0_i32 = arith.constant 0 : i32
    %c0_i32_0 = arith.constant 0 : i32
    %c0_i32_1 = arith.constant 0 : i32
    return %c0_i32, %c0_i32_0 : i32, i32
  }
  func.func @transform_3(%arg0: i32) -> (i32, i32) {
    %c0_i32 = arith.constant 0 : i32
    %c0_i32_0 = arith.constant 0 : i32
    %c0_i32_1 = arith.constant 0 : i32
    return %c0_i32, %c0_i32_0 : i32, i32
  }
  func.func @transform_4(%arg0: i32) -> (i32, i32) {
    %c0_i32 = arith.constant 0 : i32
    %c0_i32_0 = arith.constant 0 : i32
    %c0_i32_1 = arith.constant 0 : i32
    return %c0_i32, %c0_i32_0 : i32, i32
  }
  func.func @transform_5(%arg0: i32) -> (i32, i32) {
    %c0_i32 = arith.constant 0 : i32
    %c0_i32_0 = arith.constant 0 : i32
    %c0_i32_1 = arith.constant 0 : i32
    return %c0_i32, %c0_i32_0 : i32, i32
  }
  func.func @transform_6(%arg0: i32) -> (i32, i32) {
    %c0_i32 = arith.constant 0 : i32
    %c0_i32_0 = arith.constant 0 : i32
    %c0_i32_1 = arith.constant 0 : i32
    return %c0_i32, %c0_i32_0 : i32, i32
  }
  func.func @transform_7(%arg0: i32) -> (i32, i32) {
    %c0_i32 = arith.constant 0 : i32
    %c0_i32_0 = arith.constant 0 : i32
    %c0_i32_1 = arith.constant 0 : i32
    return %c0_i32, %c0_i32_0 : i32, i32
  }
  func.func @transform_8(%arg0: i32) -> (i32, i32) {
    %c0_i32 = arith.constant 0 : i32
    %c0_i32_0 = arith.constant 0 : i32
    %c0_i32_1 = arith.constant 0 : i32
    return %c0_i32, %c0_i32_0 : i32, i32
  }
  func.func @transform_9(%arg0: i32) -> (i32, i32) {
    %c0_i32 = arith.constant 0 : i32
    %c0_i32_0 = arith.constant 0 : i32
    %c0_i32_1 = arith.constant 0 : i32
    return %c0_i32, %c0_i32_0 : i32, i32
  }
  func.func @transform_10(%arg0: i32) -> (i32, i32) {
    %c0_i32 = arith.constant 0 : i32
    %c0_i32_0 = arith.constant 0 : i32
    %c0_i32_1 = arith.constant 0 : i32
    return %c0_i32, %c0_i32_0 : i32, i32
  }
  func.func @transform_11(%arg0: i32) -> (i32, i32) {
    %c0_i32 = arith.constant 0 : i32
    %c0_i32_0 = arith.constant 0 : i32
    %c0_i32_1 = arith.constant 0 : i32
    return %c0_i32, %c0_i32_0 : i32, i32
  }
  func.func @transform_12(%arg0: i32) -> (i32, i32) {
    %c0_i32 = arith.constant 0 : i32
    %c0_i32_0 = arith.constant 0 : i32
    %c0_i32_1 = arith.constant 0 : i32
    return %c0_i32, %c0_i32_0 : i32, i32
  }
  func.func @transform_13(%arg0: i32) -> (i32, i32) {
    %c0_i32 = arith.constant 0 : i32
    %c0_i32_0 = arith.constant 0 : i32
    %c0_i32_1 = arith.constant 0 : i32
    return %c0_i32, %c0_i32_0 : i32, i32
  }
  func.func @transform_14(%arg0: i32) -> (i32, i32) {
    %c0_i32 = arith.constant 0 : i32
    %c0_i32_0 = arith.constant 0 : i32
    %c0_i32_1 = arith.constant 0 : i32
    return %c0_i32, %c0_i32_0 : i32, i32
  }
  func.func @transform_15(%arg0: i32) -> (i32, i32) {
    %c0_i32 = arith.constant 0 : i32
    %c0_i32_0 = arith.constant 0 : i32
    %c0_i32_1 = arith.constant 0 : i32
    return %c0_i32, %c0_i32_0 : i32, i32
  }
  func.func @transform_16(%arg0: i32) -> (i32, i32) {
    %c0_i32 = arith.constant 0 : i32
    %c0_i32_0 = arith.constant 0 : i32
    %c0_i32_1 = arith.constant 0 : i32
    return %c0_i32, %c0_i32_0 : i32, i32
  }
  func.func @transform_17(%arg0: i32) -> (i32, i32) {
    %c0_i32 = arith.constant 0 : i32
    %c0_i32_0 = arith.constant 0 : i32
    %c0_i32_1 = arith.constant 0 : i32
    return %c0_i32, %c0_i32_0 : i32, i32
  }
  func.func @transform_18(%arg0: i32) -> (i32, i32, i32) {
    %c0_i32 = arith.constant 0 : i32
    %c0_i32_0 = arith.constant 0 : i32
    %c0_i32_1 = arith.constant 0 : i32
    return %arg0, %c0_i32, %c0_i32_0 : i32, i32, i32
  }
  func.func @transform_19(%arg0: i32) -> (i32, i32, i32) {
    %c0_i32 = arith.constant 0 : i32
    %c0_i32_0 = arith.constant 0 : i32
    %c0_i32_1 = arith.constant 0 : i32
    return %arg0, %c0_i32, %c0_i32_0 : i32, i32, i32
  }
  func.func @transform_20(%arg0: i32) -> (i32, i32, i32) {
    %c0_i32 = arith.constant 0 : i32
    %c0_i32_0 = arith.constant 0 : i32
    %c0_i32_1 = arith.constant 0 : i32
    return %arg0, %c0_i32, %c0_i32_0 : i32, i32, i32
  }
  func.func @transform_21(%arg0: i32) -> (i32, i32, i32) {
    %c0_i32 = arith.constant 0 : i32
    %c0_i32_0 = arith.constant 0 : i32
    %c0_i32_1 = arith.constant 0 : i32
    return %arg0, %c0_i32, %c0_i32_0 : i32, i32, i32
  }
}

</mosaic_0001>

<bundles_post_ra>
// kernel: tpu_custom_call.1
= control target key start
LH: loop header
LB: loop body
LE: loop exit
PB: predicated region body
PF: predicated region fallthrough
CT: control target
= control target key end

     0   :  { %s3928_s0 = inlined_call_operand.vmem [shape: f32[2,16,32], index: 0, kind: input, shape index: {}]   ;;  %s3929_s1 = inlined_call_operand.hbm [shape: f32[2,16,16], index: 1, kind: input, shape index: {}]   ;;  %s3930_s2 = inlined_call_operand.vmem [shape: f32[1,32], index: 2, kind: input, shape index: {}]   ;;  %s3931_s3 = inlined_call_operand.vmem [shape: f32[1,32], index: 3, kind: input, shape index: {}]   ;;  %s3932_s4 = inlined_call_operand.vmem [shape: f32[1,32], index: 4, kind: input, shape index: {}]   ;;  %s3933_s5 = inlined_call_operand.vmem [shape: f32[1,32], index: 5, kind: input, shape index: {}]   ;;  %s3934_s6 = inlined_call_operand.hbm [shape: f32[32,64], index: 6, kind: input, shape index: {}]   ;;  %s3935_s7 = inlined_call_operand.vmem [shape: f32[1,64], index: 7, kind: input, shape index: {}]   ;;  %s3936_s8 = inlined_call_operand.vmem [shape: bf16[32,96], index: 8, kind: input, shape index: {}]   ;;  %s3937_s9 = inlined_call_operand.vmem [shape: f32[1,96], index: 9, kind: input, shape index: {}]   ;;  %s3938_s10 = inlined_call_operand.hbm [shape: bf16[32,32], index: 10, kind: input, shape index: {}]   ;;  %s3939_s11 = inlined_call_operand.vmem [shape: f32[1,32], index: 11, kind: input, shape index: {}]   ;;  %s3940_s12 = inlined_call_operand.vmem [shape: f32[1,32], index: 12, kind: input, shape index: {}]   ;;  %s3941_s13 = inlined_call_operand.vmem [shape: f32[1,32], index: 13, kind: input, shape index: {}]   ;;  %s3942_s14 = inlined_call_operand.hbm [shape: bf16[32,64], index: 14, kind: input, shape index: {}]   ;;  %s3943_s15 = inlined_call_operand.vmem [shape: f32[1,64], index: 15, kind: input, shape index: {}]   ;;  %s3944_s16 = inlined_call_operand.vmem [shape: bf16[64,32], index: 16, kind: input, shape index: {}]   ;;  %s3945_s17 = inlined_call_operand.vmem [shape: f32[1,32], index: 17, kind: input, shape index: {}]   ;;  %s3946_s18 = inlined_call_operand.hbm [shape: f32[2,16,32], index: 18, kind: output, shape index: {0}]   ;;  %s3947_s19 = inlined_call_operand.hbm [shape: f32[2,16,16], index: 19, kind: output, shape index: {1}]   ;;  %s3948_s20 = inlined_call_operand.hbm [shape: f32[2,16,16], index: 20, kind: output, shape index: {2}]   ;;  %s3949_s21 = inlined_call_operand.vmem [shape: bf16[2,64,16], index: 21, kind: output, shape index: {3}]  }
   0x1   :  { %3960 = sst [smem:[#allocation24_spill]] %s3928_s0 }
   0x2   :  { %3961 = sst [smem:[#allocation25_spill]] %s3929_s1 }
   0x3   :  { %3962 = sst [smem:[#allocation26_spill]] %s3930_s2 }
   0x4   :  { %3963 = sst [smem:[#allocation27_spill]] %s3931_s3 }
   0x5   :  { %3964 = sst [smem:[#allocation28_spill]] %s3932_s4 }
   0x6   :  { %3965 = sst [smem:[#allocation29_spill]] %s3933_s5 }
   0x7   :  { %3966 = sst [smem:[#allocation30_spill]] %s3934_s6 }
   0x8   :  { %3967 = sst [smem:[#allocation31_spill]] %s3935_s7 }
   0x9   :  { %3968 = sst [smem:[#allocation32_spill]] %s3936_s8 }
   0xa   :  { %3969 = sst [smem:[#allocation33_spill]] %s3937_s9 }
   0xb   :  { %3970 = sst [smem:[#allocation34_spill]] %s3938_s10 }
   0xc   :  { %3971 = sst [smem:[#allocation35_spill]] %s3942_s14 }
   0xd   :  { %3972 = sst [smem:[#allocation36_spill]] %s3945_s17 }
   0xe   :  { %3973 = sst [smem:[#allocation37_spill]] %s3946_s18 }
   0xf   :  { %27 = vsyncpa [#allocation3], 0 }
  0x10   :  { %29 = vsyncpa [#allocation3 + $0x1], 0 }
  0x11   :  { %30 = vsyncpa [#allocation6], 0 }
  0x12   :  { %31 = vsyncpa [#allocation9], 0 }
  0x13   :  { %32 = vsyncpa [#allocation4], 0 }
  0x14   :  { %34 = vsyncpa [#allocation4 + $0x1], 0 }
  0x15   :  { %35 = vsyncpa [#allocation12], 0 }
  0x16   :  { %37 = vsyncpa [#allocation12 + $0x1], 0  ;;  %s3326_s2 = smov 0   ;;  %s3328_s25 = smov 0  }
  0x17   :  { %s3330_s26 = smov 0   ;;  %s3332_s27 = smov 0  }
  0x18 LB: > { %3974 = sst [smem:[#allocation19_spill]] %s3179_s2  ;;  %s3347_s3 = sadd.s32 4294967295, %s3191_s27   ;;  %s3191_s27 = sphi %s3332_s27, %s4005_s27   ;;  %s3187_s26 = sphi %s3330_s26, %s4007_s26   ;;  %s3183_s25 = sphi %s3328_s25, %s4009_s25   ;;  %s3179_s2 = sphi %s3326_s2, %s4008_s2  }
  0x19   : > { %3975 = sst [smem:[#allocation20_spill]] %s3187_s26  ;;  %s3951_s28 = sadd.s32 4294967294, %s3191_s27  }
  0x1a   : > { %p89_p0 = scmp.ne.s32.totalorder %s3183_s25, %s3179_s2  ;;  %p90_p1 = scmp.eq.s32.totalorder %s3347_s3, 0 }
  0x1b   : > { %p449_p2 = scmp.eq.s32.totalorder %s3347_s3, 1  ;;  %p455_p3 = scmp.eq.s32.totalorder %s3951_s28, 1 }
  0x1c   : > { %p3358_p4 = por %p90_p1, %p89_p0  ;;  %p2606_p5 = scmp.ge.s32.totalorder %s3191_s27, 1 }
  0x1d   : > { %p3363_p6 = por %p455_p3, %p89_p0  ;;  %p540_p7 = scmp.lt.s32.totalorder %s3191_s27, 3 }
  0x1e   : > { %s3979_s6 = sld [smem:[#allocation30_spill]]  ;;  %s3193_s23 = smov [#allocation5]  }
  0x1f   : > { %s3977_s0 = scalar_select %p3363_p6, 1, 0 }
  0x20   : > { %p3371_p8 = pnand %p2606_p5, %p540_p7  ;;  %s565_s1 = sshll.u32 %s3193_s23, 4  ;;  %s566_s1 = int_to_ptr.vmem [resolvable:$true] %s565_s1 }
  0x21   : > { %3978 = sst [smem:[#allocation21_spill]] %s3977_s0  ;;  %s3956_s0 = smov 8  }
  0x22   : > { %p2772_p9 = pneg %p3371_p8  ;;  %s3982_s10 = sld [smem:[#allocation34_spill]] }
  0x23   : > { %s3196_s23 = smov [#allocation7]   ;;  %s3197_s4 = smov 64  }
  0x24   : > { %s563_s5 = sshll.u32 %s3979_s6, 4  ;;  %p3379_p10 = pnand %p2772_p9, %p90_p1  ;;  %s564_s5 = int_to_ptr.hbm [resolvable:$true] %s563_s5 }
  0x25   : > { %s3955_s6 = smov 128   ;;  %s588_s2 = sshll.u32 %s3196_s23, 4  ;;  %s589_s2 = int_to_ptr.vmem [resolvable:$true] %s588_s2 }
  0x26   : > { %2775 = dma.hbm_to_vmem [thread:$0]  (!%p3379_p10), %s564_s5, 512, %s566_s1, [#allocation6], %s3955_s6, %s3955_s6, %s3956_s0  }
  0x27   : > { %s3198_s30 = smov 4   ;;  %s3983_s14 = sld [smem:[#allocation35_spill]] }
  0x28   : > { %s586_s28 = sshll.u32 %s3982_s10, 4  ;;  %s3199_s5 = smov [#allocation8]   ;;  %s587_s28 = int_to_ptr.hbm [resolvable:$true] %s586_s28 }
  0x29   : > { %2778 = dma.hbm_to_vmem [thread:$0]  (!%p3379_p10), %s587_s28, 256, %s589_s2, [#allocation6], %s3197_s4, %s3197_s4, %s3198_s30  }
  0x2a   : > { %s611_s1 = sshll.u32 %s3199_s5, 4  ;;  %s3400_s23 = sadd.s32 1, %s3191_s27   ;;  %s612_s1 = int_to_ptr.vmem [resolvable:$true] %s611_s1 }
  0x2b   : > { %3984 = sst [smem:[#allocation22_spill]] %s3400_s23  ;;  %s73_s6 = ssub.s32 %s3191_s27, %s3400_s23 }
  0x2c   : > { %s76_s0 = sadd.s32 1, %s3187_s26  ;;  %p74_p12 = scmp.eq.s32.totalorder %s73_s6, 0 }
  0x2d   : > { %s609_s17 = sshll.u32 %s3983_s14, 4  ;;  %p83_p13 = scmp.ne.s32.totalorder %s3187_s26, %s3183_s25  ;;  %s610_s17 = int_to_ptr.hbm [resolvable:$true] %s609_s17 }
  0x2e   : > { %2781 = dma.hbm_to_vmem [thread:$0]  (!%p3379_p10), %s610_s17, 256, %s612_s1, [#allocation9], %s3197_s4, %s3197_s4, %s3198_s30  }
  0x2f   : > { %p84_p0 = scmp.eq.s32.totalorder %s3191_s27, 0  ;;  %p3413_p3 = por %p449_p2, %p83_p13 }
  0x30   : > { %s3409_s2 = scalar_select %p74_p12, %s3187_s26, %s76_s0  }
  0x31   : > { %p2799_p5 = scmp.lt.s32.totalorder %s3191_s27, 2  ;;  %s642_s18 = sand.u32 1, %s3187_s26  }
  0x32   : > { %3985 = sst [smem:[#allocation23_spill]] %s3409_s2  ;;  %s2726_s28 = sshll.u32 %s3191_s27, 4 }
  0x33   : > { %p85_p7 = por %p84_p0, %p83_p13  ;;  %s2611_s17 = sshll.u32 %s642_s18, 4 }
  0x34   : > { %s3987_s30 = sld [smem:[#allocation25_spill]]  ;;  %s646_s6 = scalar_lea.vmem [#allocation2], %s2611_s17 }
  0x35   : > { %s654_s14 = sshll.u32 %s646_s6, 4  ;;  %p3423_p9 = pnand %p2799_p5, %p85_p7  ;;  %s655_s14 = int_to_ptr.vmem [resolvable:$true] %s654_s14 }
  0x36   : > { %s643_s2 = scalar_lea.sflag [#allocation3], %s642_s18 }
  0x37   : > { %p3031_p10 = pneg %p3423_p9 }
  0x3a   : > { %s651_s5 = scalar_lea.hbm %s3987_s30, %s2726_s28  ;;  %s3034_s17 = scalar_lea.hbm %s3987_s30, 32 }
  0x3b   : > { %s652_s1 = sshll.u32 %s651_s5, 4  ;;  %s653_s1 = int_to_ptr.hbm [resolvable:$true] %s652_s1 }
  0x3c   : > { %s3027_s23 = sshra.s32 %s653_s1, 4  ;;  %s3028_s23 = int_to_ptr.hbm [resolvable:$true] %s3027_s23 }
  0x3d   : > { %s3029_s26 = scalar_lea.hbm %s3028_s23, 16  ;;  %p3035_p0 = scmp.lt.s32.totalorder %s3028_s23, %s3987_s30 }
  0x3e   : > { %p3030_p2 = scmp.ne.s32.totalorder %s3028_s23, %s3029_s26  ;;  %p3036_p5 = scmp.lt.s32.totalorder %s3034_s17, %s3029_s26 }
  0x40   : > { %p3032_p12 = pnand %p3031_p10, %p3030_p2  ;;  %p3037_p7 = por %p3036_p5, %p3035_p0 }
  0x42   : > { %p3033_p13 = pneg %p3032_p12 }
  0x44   : > { %p3038_p11 = pnand %p3037_p7, %p3033_p13 }
  0x46   : > { %3041 = shalt.err (!%p3038_p11)
}
  0x47   : > { %s3989_s18 = smov 8   ;;  %s3990_s6 = smov 128  }
  0x48   : > { %2785 = dma.hbm_to_vmem [thread:$0]  (!%p3423_p9), %s653_s1, 256, %s655_s14, %s643_s2, %s3990_s6, %s3990_s6, %s3989_s18  }
  0x49   : > { %666 = sbr.rel (%p3371_p8) target bundleno = 3470 (0xd8e), region = 92  ;;  %s3443_s28 = sand.u32 (!%p3371_p8), 1, %s3183_s25  }
  0x4a   : > { %s3446_s23 = sshll.u32 (!%p3371_p8), %s3443_s28, 4  ;;  %s669_s26 = scalar_lea.sflag (!%p3371_p8), [#allocation3], %s3443_s28 }
  0x4b   : > { %s672_s24 = scalar_lea.vmem (!%p3371_p8), [#allocation2], %s3446_s23 }
  0x4e   : > { %3158 = dma.done.wait (%p3358_p4), %s669_s26, 256  }
  0x4f   : > { %3160 = vsyncadd (%p3358_p4), %s669_s26, 4294967040 }
  0x50   : > { %3162 = dma.done.wait (%p90_p1), [#allocation6], 768  }
  0x51   : > { %3164 = vsyncadd (%p90_p1), [#allocation6], 4294966528 }
  0x52   : > { %3166 = dma.done.wait (%p90_p1), [#allocation9], 256  }
  0x53   : > { %3168 = vsyncadd (%p90_p1), [#allocation9], 4294967040  ;;  %p767_p8 = scmp.lt.s32.totalorder %s3347_s3, 1  ;;  %s3991_s1 = sld [smem:[#allocation24_spill]]  ;;  %vm807_vm0 = vcmask 261120   ;;  %v3200_v4 = vmov 32.0  }
  0x54   : > { %2873 = vrcp.f32 %v3200_v4  ;;  %v886_v21 = vld [vmem:[#allocation5 + $0x18] sm:$0xff]  ;;  %v885_v24 = vld [vmem:[#allocation5 + $0x10] sm:$0xff]  ;;  %v884_v28 = vld [vmem:[#allocation5 + $0x8] sm:$0xff]  ;;  %s3992_s5 = sld [smem:[#allocation26_spill]]  ;;  %s3201_s6 = smov 96   ;;  %vm1319_vm13 = vcmask 130048  }
  0x55   : > { %s3464_s14 = scalar_select %p767_p8, %s3347_s3, 1  ;;  %v3490_v22 = vand.u32 4294901760, %v886_v21  ;;  %v3494_v26 = vand.u32 4294901760, %v885_v24  ;;  %v3500_v30 = vand.u32 4294901760, %v884_v28  ;;  %v883_v32 = vld [vmem:[#allocation5] sm:$0xff] }
  0x56   : > { %v3503_v34 = vand.u32 4294901760, %v883_v32  ;;  %s3993_s26 = sld [smem:[#allocation27_spill]]  ;;  %s3205_s18 = smov 88  }
  0x57   : > { %s2727_s29 = sshll.u32 %s3464_s14, 4  ;;  %2748 = vmatpush.msra.mxu1 %v3490_v22  ;;  %v947_v27 = vsub.f32 %v886_v21, %v3490_v22  ;;  %1027 = vmatpush.msra.mxu3 %v3490_v22  ;;  %v953_v31 = vsub.f32 %v885_v24, %v3494_v26  ;;  %v959_v35 = vsub.f32 %v884_v28, %v3500_v30  ;;  %s3994_s2 = sld [smem:[#allocation28_spill]] }
  0x58   : > { %910 = vmatpush.msra.mxu0 %v3490_v22  ;;  %v965_v39 = vsub.f32 %v883_v32, %v3503_v34  ;;  %s3995_s4 = sld [smem:[#allocation29_spill]]  ;;  %s3209_s22 = smov 104  }
  0x59   : > { %s3470_s0 = scalar_lea.vmem %s3991_s1, %s2727_s29  ;;  %2749 = vmatpush.msra.mxu1 %v3494_v26  ;;  %993 = vmatpush.msra.mxu2 %v947_v27  ;;  %v948_v33 = vand.u32 4294901760, %v947_v27  ;;  %v954_v37 = vand.u32 4294901760, %v953_v31  ;;  %v960_v40 = vand.u32 4294901760, %v959_v35  ;;  %s3996_s7 = sld [smem:[#allocation31_spill]] }
  0x5a   : > { %v779_v0 = vld [vmem:[%s3470_s0 + $0x8] sm:$0xff]  ;;  %v778_v2 = vld [vmem:[%s3470_s0] sm:$0xff]  ;;  %v2874_v5 = vpop.eup %2873  ;;  %1029 = vmatpush.msra.mxu3 %v3494_v26  ;;  %912 = vmatpush.msra.mxu0 %v3494_v26  ;;  %v966_v45 = vand.u32 4294901760, %v965_v39  ;;  %s3997_s8 = sld [smem:[#allocation32_spill]]  ;;  %s3208_s29 = smov 72  }
  0x5b   : > { %v811_v1 = vsel %vm807_vm0, %v779_v0, 0.0  ;;  %v808_v3 = vsel %vm807_vm0, %v778_v2, 0.0  ;;  %v815_v6 = vmul.f32 32.0, %v2874_v5  ;;  %vm819_vm1 = vweird.f32 %v2874_v5  ;;  %2750 = vmatpush.msra.mxu1 %v3500_v30  ;;  %996 = vmatpush.msra.mxu2 %v953_v31  ;;  %v2864_v59 = vld [vmem:[%s3992_s5] ss:$0 sm:$0xff]  ;;  %s3998_s9 = sld [smem:[#allocation33_spill]] }
  0x5c   : > { %812 = vadd.xlane.f32.xlu0 %v811_v1  ;;  %v949_v36 = vsub.f32 %v947_v27, %v948_v33  ;;  %1031 = vmatpush.msra.mxu3 %v3500_v30  ;;  %v955_v42 = vsub.f32 %v953_v31, %v954_v37  ;;  %v961_v44 = vsub.f32 %v959_v35, %v960_v40  ;;  %v2865_v63 = vld [vmem:[%s3993_s26] ss:$0 sm:$0xff]  ;;  %s3605_s26 = scalar_lea.vmem [#allocation13], %s3446_s23  ;;  %s3204_s5 = smov 64  }
  0x5d   : > { %v816_v7 = vsub.f32 1.0, %v815_v6  ;;  %914 = vmatpush.msra.mxu0 %v3500_v30  ;;  %2751 = vmatpush.msra.mxu1 %v3503_v34  ;;  %v967_v50 = vsub.f32 %v965_v39, %v966_v45  ;;  %s2728_s1 = sshll.u32 %s3464_s14, 5  ;;  %s3211_s14 = smov 56  }
  0x5e   : > { %999 = vmatpush.msra.mxu2 %v959_v35  ;;  %v950_v38 = vand.u32 4294901760, %v949_v36  ;;  %1033 = vmatpush.msra.mxu3 %v3503_v34  ;;  %v956_v46 = vand.u32 4294901760, %v955_v42  ;;  %v962_v49 = vand.u32 4294901760, %v961_v44  ;;  %s3839_s17 = sshll.u32 %s3347_s3, 4 }
  0x5f   : > { %v817_v8 = vmul.f32 %v2874_v5, %v816_v7  ;;  %916 = vmatpush.msra.mxu0 %v3503_v34  ;;  %v968_v52 = vand.u32 4294901760, %v967_v50 }
  0x60   : > { %951 = vmatpush.msrb.mxu1 %v950_v38  ;;  %1002 = vmatpush.msra.mxu2 %v965_v39 }
  0x61   : > { %v818_v9 = vadd.f32 %v2874_v5, %v817_v8  ;;  %1062 = vmatpush.msrb.mxu0 %v948_v33 }
  0x62   : > { %957 = vmatpush.msrb.mxu1 %v956_v46 }
  0x63   : > { %v3476_v10 = vsel %vm819_vm1, %v2874_v5, %v818_v9  ;;  %1066 = vmatpush.msrb.mxu0 %v954_v37  ;;  %v2863_v9 = vld [vmem:[%s3995_s4] ss:$0 sm:$0xff]  ;;  %s3682_s4 = scalar_lea.vmem [#allocation11], %s3446_s23 }
  0x64   : > { %809 = vadd.xlane.f32.xlu0 %v808_v3  ;;  %963 = vmatpush.msrb.mxu1 %v962_v49  ;;  %v2862_v3 = vld [vmem:[%s3994_s2] ss:$0 sm:$0xff]  ;;  %s3210_s2 = smov 112  }
  0x65   : > { %1070 = vmatpush.msrb.mxu0 %v960_v40 }
  0x66   : > { %969 = vmatpush.msrb.mxu1 %v968_v52 }
  0x67   : > { %1074 = vmatpush.msrb.mxu0 %v966_v45 }
  0xcf   : > { %v813_v11 = vpop.xlane.xlu0 %812 }
  0xd0   : > { %v822_v12 = vmul.f32 %v3476_v10, %v813_v11 }
  0xd2   : > { %v3479_v13 = vsub.f32 %v779_v0, %v822_v12 }
  0xd4   : > { %v826_v14 = vmul.f32 %v3479_v13, %v3479_v13 }
  0xd6   : > { %v830_v15 = vsel %vm807_vm0, %v826_v14, 0.0 }
  0xd7   : > { %831 = vadd.xlane.f32.xlu1 %v830_v15  ;;  %v810_v16 = vpop.xlane.xlu0 %809 }
  0xd8   : > { %v821_v17 = vmul.f32 %v3476_v10, %v810_v16 }
  0xda   : > { %v3485_v18 = vsub.f32 %v778_v2, %v821_v17 }
  0xdc   : > { %v825_v19 = vmul.f32 %v3485_v18, %v3485_v18 }
  0xde   : > { %v827_v20 = vsel %vm807_vm0, %v825_v19, 0.0 }
  0xdf   : > { %828 = vadd.xlane.f32.xlu1 %v827_v20 }
 0x14a   : > { %v832_v23 = vpop.xlane.xlu1 %831 }
 0x14b   : > { %v834_v25 = vmul.f32 %v832_v23, %v3476_v10 }
 0x14d   : > { %v836_v29 = vadd.f32 1e-05, %v834_v25 }
 0x14f   : > { %2875 = vrsqrt.f32 %v836_v29  ;;  %vm853_vm3 = vweird.f32 %v836_v29 }
 0x152   : > { %v829_v41 = vpop.xlane.xlu1 %828 }
 0x153   : > { %v833_v43 = vmul.f32 %v829_v41, %v3476_v10 }
 0x155   : > { %v2876_v47 = vpop.eup %2875  ;;  %v835_v48 = vadd.f32 1e-05, %v833_v43 }
 0x156   : > { %v848_v51 = vmul.f32 %v2876_v47, %v836_v29  ;;  %vm854_vm2 = vweird.f32 %v2876_v47 }
 0x157   : > { %2877 = vrsqrt.f32 %v835_v48  ;;  %vm855_vm4 = vmor %vm853_vm3, %vm854_vm2  ;;  %vm843_vm5 = vweird.f32 %v835_v48 }
 0x158   : > { %v849_v53 = vmul.f32 %v2876_v47, %v848_v51 }
 0x15a   : > { %v850_v54 = vmul.f32 0.5, %v849_v53 }
 0x15c   : > { %v851_v55 = vsub.f32 1.5, %v850_v54 }
 0x15d   : > { %v2878_v56 = vpop.eup %2877 }
 0x15e   : > { %v852_v57 = vmul.f32 %v2876_v47, %v851_v55  ;;  %v838_v58 = vmul.f32 %v2878_v56, %v835_v48  ;;  %vm844_vm6 = vweird.f32 %v2878_v56 }
 0x15f   : > { %vm845_vm7 = vmor %vm843_vm5, %vm844_vm6 }
 0x160   : > { %v856_v60 = vsel %vm855_vm4, %v2876_v47, %v852_v57  ;;  %v839_v61 = vmul.f32 %v2878_v56, %v838_v58 }
 0x161   : > { %v858_v62 = vmul.f32 %v856_v60, %v3479_v13 }
 0x162   : > { %v840_v0 = vmul.f32 0.5, %v839_v61 }
 0x163   : > { %v864_v1 = vmul.f32 %v2864_v59, %v858_v62  ;;  %v876_v11 = vmul.f32 %v2862_v3, %v858_v62 }
 0x164   : > { %v841_v2 = vsub.f32 1.5, %v840_v0 }
 0x165   : > { %v870_v4 = vadd.f32 %v2865_v63, %v864_v1  ;;  %v3531_v17 = vadd.f32 %v2863_v9, %v876_v11 }
 0x166   : > { %v842_v5 = vmul.f32 %v2878_v56, %v841_v2 }
 0x167   : > { %v895_v6 = vsel %vm807_vm0, %v870_v4, 0 }
 0x168   : > { %v846_v7 = vsel %vm845_vm7, %v2878_v56, %v842_v5  ;;  %v925_v8 = vand.u32 4294901760, %v895_v6 }
 0x169   : > { %v857_v12 = vmul.f32 %v846_v7, %v3485_v18 }
 0x16a   : > { %v926_v13 = vsub.f32 %v895_v6, %v925_v8 }
 0x16b   : > { %v875_v14 = vmul.f32 %v2862_v3, %v857_v12  ;;  %v863_v15 = vmul.f32 %v2864_v59, %v857_v12 }
 0x16c   : > { %v927_v16 = vand.u32 4294901760, %v926_v13 }
 0x16d   : > { %v3533_v19 = vadd.f32 %v2863_v9, %v875_v14  ;;  %v869_v20 = vadd.f32 %v2865_v63, %v863_v15 }
 0x16e   : > { %v928_v21 = vsub.f32 %v926_v13, %v927_v16 }
 0x16f   : > { %v892_v23 = vsel %vm807_vm0, %v869_v20, 0  ;;  %v1653_v24 = vpack.c.bf16 %v3531_v17, %v3533_v19  ;;  %v782_v20 = vlaneseq }
 0x170   : > { %v929_v25 = vand.u32 4294901760, %v928_v21  ;;  %v917_v27 = vand.u32 4294901760, %v892_v23 }
 0x171   : > { %v3551_v21 = vshrl.u32 %v782_v20, 7 }
 0x172   : > { %930 = vmatmul.f32.vlgmr.msra.gmra.mxu1 %v929_v25  ;;  %v918_v28 = vsub.f32 %v892_v23, %v917_v27 }
 0x173   : > { %1097 = vmatpush.msra.mxu1 %v3490_v22  ;;  %2859 = vset.pattern.permute.xlu0 %v3551_v21  ;;  %v3555_v23 = vadd.s32 8, %v3551_v21 }
 0x174   : > { %1005 = vmatmul.f32.vlgmr.msra.gmra.mxu2 %v918_v28  ;;  %v919_v18 = vand.u32 4294901760, %v918_v28 }
 0x175   : > { %1099 = vmatpush.msra.mxu1 %v3494_v26  ;;  %2860 = vset.pattern.permute.xlu2 %v3555_v23 }
 0x176   : > { %1037 = vmatmul.f32.vlgmr.msra.gmra.mxu3 %v919_v18  ;;  %v920_v29 = vsub.f32 %v918_v28, %v919_v18 }
 0x177   : > { %1101 = vmatpush.msra.mxu1 %v3500_v30  ;;  %v2866_v30 = vld [vmem:[%s3996_s7] ss:$0 sm:$0xff] }
 0x178   : > { %v921_v31 = vand.u32 4294901760, %v920_v29 }
 0x179   : > { %1103 = vmatpush.msra.mxu1 %v3503_v34 }
 0x17a   : > { %922 = vmatmul.f32.vlgmr.msra.gmra.mxu0 %v921_v31  ;;  %971 = vmatmul.f32.vlgmr.msrb.gmra.mxu1 %v917_v27  ;;  %v3558_v31 = vand.u32 127, %v782_v20 }
 0x17c   : > { %1010 = vmatmul.f32.gmra.mxu2 %v926_v13  ;;  %vm787_vm8 = vcmp.eq.s32.totalorder %v3551_v21, %v3558_v31  ;;  %vm788_vm14 = vcmp.eq.s32.totalorder %v3555_v23, %v3558_v31 }
 0x17e   : > { %1043 = vmatmul.f32.gmra.mxu3 %v927_v16 }
 0x182   : > { %975 = vmatmul.f32.gmra.mxu1 %v925_v8  ;;  %1076 = vmatmul.f32.vlgmr.msrb.gmra.mxu0 %v917_v27 }
 0x18a   : > { %1080 = vmatmul.f32.gmra.mxu0 %v925_v8  ;;  %1105 = vmatmul.f32.vlgmr.msra.gmra.mxu1 %v917_v27 }
 0x192   : > { %1109 = vmatmul.f32.gmra.mxu1 %v925_v8 }
 0x1ef   : > { %v931_v22 = vpop.f32.mrf.mxu1 }
 0x1f0   : > { %v932_v37 = vadd.f32 %v2866_v30, %v931_v22  ;;  %v3561_v22 = vadd.s32 1, %v3551_v21 }
 0x1f2   : > { %vm791_vm9 = vcmp.eq.s32.totalorder %v3558_v31, %v3561_v22 }
 0x1f3   : > { %vm793_vm10 = vmor %vm787_vm8, %vm791_vm9 }
 0x1f7   : > { %v923_v32 = vpop.f32.mrf.mxu0  ;;  %v972_v33 = vpop.f32.mrf.mxu1 }
 0x1f8   : > { %v1006_v26 = vpop.f32.mrf.mxu2  ;;  %v924_v39 = vadd.f32 %v2866_v30, %v923_v32 }
 0x1f9   : > { %v1038_v36 = vpop.f32.mrf.mxu3 }
 0x1fa   : > { %v973_v43 = vadd.f32 %v972_v33, %v924_v39 }
 0x1fc   : > { %v1007_v47 = vadd.f32 %v1006_v26, %v973_v43  ;;  %v2626_v26 = vadd.s32 4294967295, %v3551_v21  ;;  %v2627_v43 = vadd.s32 4294967295, %v3555_v23 }
 0x1fe   : > { %v1039_v51 = vadd.f32 %v1038_v36, %v1007_v47  ;;  %vm797_vm11 = vcmp.eq.s32.totalorder %v3558_v31, %v2626_v26  ;;  %vm798_vm2 = vcmp.eq.s32.totalorder %v3558_v31, %v2627_v43 }
 0x1ff   : > { %v976_v35 = vpop.f32.mrf.mxu1  ;;  %v1077_v34 = vpop.f32.mrf.mxu0  ;;  %vm799_vm12 = vmor %vm793_vm10, %vm797_vm11 }
 0x200   : > { %v977_v38 = vadd.f32 %v976_v35, %v932_v37  ;;  %v1011_v40 = vpop.f32.mrf.mxu2  ;;  %v1078_v52 = vadd.f32 %v1077_v34, %v1039_v51  ;;  %v3576_v37 = vadd.s32 1, %v3555_v23 }
 0x201   : > { %v1044_v44 = vpop.f32.mrf.mxu3 }
 0x202   : > { %v1012_v42 = vadd.f32 %v1011_v40, %v977_v38  ;;  %vm792_vm15 = vcmp.eq.s32.totalorder %v3558_v31, %v3576_v37 }
 0x203   : > { %vm794_vm1 = vmor %vm788_vm14, %vm792_vm15 }
 0x204   : > { %v1045_v46 = vadd.f32 %v1044_v44, %v1012_v42  ;;  %vm800_vm3 = vmor %vm794_vm1, %vm798_vm2 }
 0x207   : > { %v1106_v41 = vpop.f32.mrf.mxu1  ;;  %v1081_v45 = vpop.f32.mrf.mxu0 }
 0x208   : > { %v1082_v48 = vadd.f32 %v1081_v45, %v1045_v46  ;;  %v1107_v53 = vadd.f32 %v1106_v41, %v1078_v52 }
 0x20a   : > { %v1119_v54 = vsel %vm807_vm0, %v1107_v53, 0 }
 0x20b   : > { %v1145_v55 = vand.u32 4294901760, %v1119_v54 }
 0x20d   : > { %v1146_v57 = vsub.f32 %v1119_v54, %v1145_v55 }
 0x20f   : > { %v1110_v49 = vpop.f32.mrf.mxu1  ;;  %v1147_v63 = vand.u32 4294901760, %v1146_v57 }
 0x210   : > { %v1111_v50 = vadd.f32 %v1110_v49, %v1082_v48 }
 0x211   : > { %v1148_v5 = vsub.f32 %v1146_v57, %v1147_v63 }
 0x212   : > { %1117 = vrot.lane.b32.xlu2 %v1111_v50, %s3201_s6  ;;  %v1121_v59 = vsel %vm807_vm0, %v1111_v50, 0 }
 0x213   : > { %v1153_v62 = vand.u32 4294901760, %v1121_v59  ;;  %v1149_v9 = vand.u32 4294901760, %v1148_v5 }
 0x215   : > { %v1154_v3 = vsub.f32 %v1121_v59, %v1153_v62 }
 0x217   : > { %v1155_v11 = vand.u32 4294901760, %v1154_v3 }
 0x219   : > { %v1156_v14 = vsub.f32 %v1154_v3, %v1155_v11 }
 0x21a   : > { %1115 = vrot.lane.b32.xlu2 %v1107_v53, %s3201_s6 }
 0x21b   : > { %v1157_v16 = vand.u32 4294901760, %v1156_v14 }
 0x26c   : > { %v1118_v56 = vpop.permute.xlu2 %1117 }
 0x26d   : > { %v1125_v58 = vsel %vm807_vm0, %v1118_v56, 0 }
 0x26e   : > { %v1141_v60 = vand.u32 4294901760, %v1125_v58 }
 0x270   : > { %v1177_v61 = vsub.f32 %v1125_v58, %v1141_v60  ;;  %1142 = vmatpush.xpose.msrb.mxu2 %v1141_v60  ;;  %1243 = vmatpush.xpose.msrb.mxu1 %v1141_v60 }
 0x272   : > { %1213 = vmatpush.xpose.msra.mxu0 %v1177_v61  ;;  %v1178_v0 = vand.u32 4294901760, %v1177_v61 }
 0x274   : > { %v1116_v1 = vpop.permute.xlu2 %1115  ;;  %v1179_v2 = vsub.f32 %v1177_v61, %v1178_v0 }
 0x275   : > { %v1123_v4 = vsel %vm807_vm0, %v1116_v1, 0 }
 0x276   : > { %v1143_v6 = vand.u32 4294901760, %v1123_v4  ;;  %v1180_v7 = vand.u32 4294901760, %v1179_v2 }
 0x278   : > { %v1183_v8 = vsub.f32 %v1123_v4, %v1143_v6  ;;  %1144 = vmatpush.xpose.msrb.mxu2 %v1143_v6  ;;  %1181 = vmatpush.xpose.msrb.mxu3 %v1180_v7 }
 0x279   : > { %1245 = vmatpush.xpose.msrb.mxu1 %v1143_v6 }
 0x27a   : > { %1216 = vmatpush.xpose.msra.mxu0 %v1183_v8  ;;  %v1184_v12 = vand.u32 4294901760, %v1183_v8 }
 0x27b   : > { %1150 = vmatmul.f32.vlgmr.msrb.gmra.mxu2 %v1149_v9 }
 0x27c   : > { %1276 = vmatpush.xpose.msra.mxu2 %v1178_v0  ;;  %1249 = vmatmul.f32.vlgmr.msrb.gmra.mxu1 %v1147_v63  ;;  %v1185_v13 = vsub.f32 %v1183_v8, %v1184_v12 }
 0x27d   : > { %1219 = vmatmul.f32.vlgmr.msra.gmra.mxu0 %v1146_v57 }
 0x27e   : > { %v1186_v15 = vand.u32 4294901760, %v1185_v13 }
 0x280   : > { %1280 = vmatpush.xpose.msra.mxu2 %v1184_v12  ;;  %1187 = vmatpush.xpose.msrb.mxu3 %v1186_v15 }
 0x283   : > { %1158 = vmatmul.f32.gmra.mxu2 %v1157_v16  ;;  %1189 = vmatmul.f32.vlgmr.msrb.gmra.mxu3 %v1145_v55 }
 0x284   : > { %1305 = vmatpush.xpose.msra.mxu3 %v1141_v60  ;;  %1255 = vmatmul.f32.gmra.mxu1 %v1155_v11 }
 0x285   : > { %1224 = vmatmul.f32.gmra.mxu0 %v1154_v3 }
 0x288   : > { %1307 = vmatpush.xpose.msra.mxu3 %v1143_v6 }
 0x28b   : > { %1193 = vmatmul.f32.gmra.mxu3 %v1153_v62  ;;  %1282 = vmatmul.f32.vlgmr.msra.gmra.mxu2 %v1145_v55 }
 0x293   : > { %1286 = vmatmul.f32.gmra.mxu2 %v1153_v62  ;;  %1309 = vmatmul.f32.vlgmr.msra.gmra.mxu3 %v1145_v55 }
 0x29b   : > { %1313 = vmatmul.f32.gmra.mxu3 %v1153_v62 }
 0x2f9   : > { %v1250_v30 = vpop.f32.mrf.mxu1 }
 0x2fa   : > { %v1220_v29 = vpop.f32.mrf.mxu0 }
 0x2fe   : > { %v1151_v25 = vpop.f32.mrf.mxu2 }
 0x301   : > { %v1256_v45 = vpop.f32.mrf.mxu1 }
 0x302   : > { %v1225_v39 = vpop.f32.mrf.mxu0 }
 0x306   : > { %v1159_v27 = vpop.f32.mrf.mxu2  ;;  %v1190_v28 = vpop.f32.mrf.mxu3 }
 0x307   : > { %v1191_v18 = vadd.f32 %v1190_v28, %v1151_v25 }
 0x309   : > { %v1221_v33 = vadd.f32 %v1220_v29, %v1191_v18 }
 0x30b   : > { %v1251_v34 = vadd.f32 %v1250_v30, %v1221_v33 }
 0x30e   : > { %v1194_v32 = vpop.f32.mrf.mxu3  ;;  %v1283_v35 = vpop.f32.mrf.mxu2 }
 0x30f   : > { %v1195_v36 = vadd.f32 %v1194_v32, %v1159_v27  ;;  %v1284_v38 = vadd.f32 %v1283_v35, %v1251_v34 }
 0x311   : > { %v1226_v41 = vadd.f32 %v1225_v39, %v1195_v36 }
 0x313   : > { %v1257_v48 = vadd.f32 %v1256_v45, %v1226_v41  ;;  %v780_v45 = vld [vmem:[%s672_s24] sm:$0xff] }
 0x316   : > { %v1310_v40 = vpop.f32.mrf.mxu3  ;;  %v1287_v46 = vpop.f32.mrf.mxu2 }
 0x317   : > { %v1311_v42 = vadd.f32 %v1310_v40, %v1284_v38  ;;  %v1288_v49 = vadd.f32 %v1287_v46, %v1257_v48 }
 0x319   : > { %v1317_v44 = vsel %vm799_vm12, %v1311_v42, -1e+09 }
 0x31a   : > { %v1320_v47 = vsel %vm1319_vm13, %v1317_v44, -inf }
 0x31b   : > { %1321 = vmax.xlane.f32.xlu0 %v1320_v47 }
 0x31e   : > { %v1314_v50 = vpop.f32.mrf.mxu3 }
 0x31f   : > { %v1315_v51 = vadd.f32 %v1314_v50, %v1288_v49  ;;  %v1428_v49 = vsub.f32 1.0, %v780_v45 }
 0x321   : > { %v1318_v52 = vsel %vm800_vm3, %v1315_v51, -1e+09 }
 0x322   : > { %v1323_v53 = vsel %vm1319_vm13, %v1318_v52, -inf }
 0x323   : > { %1324 = vmax.xlane.f32.xlu1 %v1323_v53 }
 0x38e   : > { %v1322_v54 = vpop.xlane.xlu0 %1321 }
 0x38f   : > { %v1326_v55 = vsub.f32 %v1317_v44, %v1322_v54 }
 0x391   : > { %v1328_v56 = vmul.f32 1.442695, %v1326_v55 }
 0x393   : > { %2879 = vpow2.f32 %v1328_v56 }
 0x396   : > { %v1325_v57 = vpop.xlane.xlu1 %1324 }
 0x397   : > { %v1327_v58 = vsub.f32 %v1318_v52, %v1325_v57  ;;  %v781_v57 = vld [vmem:[%s672_s24 + $0x8] sm:$0xff]  ;;  %s3207_s24 = smov 80  }
 0x399   : > { %v2880_v59 = vpop.eup %2879  ;;  %v1330_v60 = vmul.f32 1.442695, %v1327_v58 }
 0x39a   : > { %v1332_v61 = vsel %vm1319_vm13, %v2880_v59, 0.0 }
 0x39b   : > { %2881 = vpow2.f32 %v1330_v60  ;;  %1333 = vadd.xlane.f32.xlu2 %v1332_v61 }
 0x3a1   : > { %v2882_v62 = vpop.eup %2881 }
 0x3a2   : > { %v1335_v63 = vsel %vm1319_vm13, %v2882_v62, 0.0 }
 0x3a3   : > { %1336 = vadd.xlane.f32.xlu0 %v1335_v63 }
 0x40e   : > { %v1334_v0 = vpop.xlane.xlu2 %1333 }
 0x40f   : > { %2883 = vrcp.f32 %v1334_v0  ;;  %v1349_v5 = vand.u32 2147483648, %v1334_v0  ;;  %v1347_v7 = vand.u32 2147483647, %v1334_v0  ;;  %vm1343_vm5 = vweird.f32 %v1334_v0 }
 0x411   : > { %v1350_v11 = vor.u32 1.1754944e-38, %v1349_v5  ;;  %vm1348_vm7 = vcmp.eq.f32.partialorder %v1347_v7, 8.507059e+37 }
 0x415   : > { %v2884_v1 = vpop.eup %2883 }
 0x416   : > { %v1339_v2 = vmul.f32 %v2884_v1, %v1334_v0  ;;  %v1337_v3 = vpop.xlane.xlu0 %1336  ;;  %vm1344_vm4 = vweird.f32 %v2884_v1 }
 0x417   : > { %2885 = vrcp.f32 %v1337_v3  ;;  %vm1345_vm6 = vmor %vm1343_vm5, %vm1344_vm4  ;;  %v1364_v20 = vand.u32 2147483648, %v1337_v3  ;;  %v1362_v27 = vand.u32 2147483647, %v1337_v3  ;;  %vm1358_vm11 = vweird.f32 %v1337_v3 }
 0x418   : > { %v1340_v4 = vsub.f32 1.0, %v1339_v2 }
 0x419   : > { %v1365_v18 = vor.u32 1.1754944e-38, %v1364_v20  ;;  %vm1363_vm1 = vcmp.eq.f32.partialorder %v1362_v27, 8.507059e+37  ;;  %v3203_v20 = vmov 1.0   ;;  %v2729_v27 = vld [vmem:[%s3997_s8] sm:$0xff] }
 0x41a   : > { %v1341_v6 = vmul.f32 %v2884_v1, %v1340_v4 }
 0x41c   : > { %v1342_v8 = vadd.f32 %v2884_v1, %v1341_v6  ;;  %v3202_v6 = vmov 0.0  }
 0x41d   : > { %v2886_v9 = vpop.eup %2885 }
 0x41e   : > { %v1354_v12 = vmul.f32 %v2886_v9, %v1337_v3  ;;  %v1346_v13 = vsel %vm1345_vm6, %v2884_v1, %v1342_v8  ;;  %vm1359_vm10 = vweird.f32 %v2886_v9  ;;  %vm801_vm6 = vcmp.lt.s32.totalorder %v3551_v21, %v3558_v31 }
 0x41f   : > { %v1351_v14 = vsel %vm1348_vm7, %v1350_v11, %v1346_v13  ;;  %vm1360_vm12 = vmor %vm1358_vm11, %vm1359_vm10  ;;  %v2628_v37 = vsel %vm801_vm6, 1.0, %v3202_v6  ;;  %vm1696_vm7 = vcmask 64512   ;;  %vm1631_vm10 = vcmp.gt.s32.totalorder %v3558_v31, %v3551_v21 }
 0x420   : > { %v1355_v15 = vsub.f32 1.0, %v1354_v12  ;;  %v1352_v16 = vmul.f32 %v2880_v59, %v1351_v14  ;;  %v1505_v11 = vsub.f32 %v2628_v37, %v2628_v37 }
 0x422   : > { %v1356_v25 = vmul.f32 %v2886_v9, %v1355_v15  ;;  %1368 = vxpose.xlu1.b32.start [1/2] (short) (narrow) %v1352_v16, 16  ;;  %v1506_v13 = vand.u32 4294901760, %v1505_v11 }
 0x424   : > { %v1357_v28 = vadd.f32 %v2886_v9, %v1356_v25  ;;  %v1507_v15 = vsub.f32 %v1505_v11, %v1506_v13  ;;  %v2730_v25 = vld [vmem:[%s3997_s8 + $0x8] sm:$0xff]  ;;  %s3077_s8 = scalar_lea.hbm %s3947_s19, 32 }
 0x426   : > { %v1361_v29 = vsel %vm1360_vm12, %v2886_v9, %v1357_v28 }
 0x427   : > { %v1366_v32 = vsel %vm1363_vm1, %v1365_v18, %v1361_v29 }
 0x428   : > { %v1367_v33 = vmul.f32 %v2882_v62, %v1366_v32  ;;  %v1429_v62 = vsub.f32 1.0, %v781_v57 }
 0x42a   : > { %1369 = vxpose.xlu1.b32.end [2/2] (short) (narrow) %v1367_v33, 16 }
 0x4c6   : > { %v1384_v26 = vpop.trf.xlu1 }
 0x4c7   : > { %v1400_v30 = vmul.f32 %v1384_v26, %v1352_v16  ;;  %v1508_v16 = vand.u32 4294901760, %v1507_v15 }
 0x4c9   : > { %v1402_v35 = vadd.f32 1e-09, %v1400_v30  ;;  %v1451_v30 = vadd.s32 4294967288, %v3558_v31 }
 0x4cb   : > { %2887 = vrsqrt.f32 %v1402_v35  ;;  %vm1411_vm2 = vcmp.eq.f32.partialorder %v1402_v35, inf  ;;  %v1414_v51 = vand.u32 2147483648, %v1402_v35  ;;  %vm1413_vm3 = vcmp.eq.f32.partialorder %v1402_v35, 0.0 }
 0x4ce   : > { %v1385_v36 = vpop.trf.xlu1 }
 0x4cf   : > { %v1401_v34 = vmul.f32 %v1385_v36, %v1367_v33 }
 0x4d1   : > { %v2888_v38 = vpop.eup %2887  ;;  %v1403_v39 = vadd.f32 1e-09, %v1401_v34 }
 0x4d2   : > { %v1405_v40 = vmul.f32 %v2888_v38, %v1402_v35 }
 0x4d3   : > { %2889 = vrsqrt.f32 %v1403_v39  ;;  %vm1423_vm4 = vcmp.eq.f32.partialorder %v1403_v39, inf  ;;  %v1426_v0 = vand.u32 2147483648, %v1403_v39  ;;  %vm1425_vm5 = vcmp.eq.f32.partialorder %v1403_v39, 0.0 }
 0x4d4   : > { %v1406_v41 = vmul.f32 %v2888_v38, %v1405_v40 }
 0x4d6   : > { %v1407_v42 = vmul.f32 0.5, %v1406_v41 }
 0x4d8   : > { %v1408_v43 = vsub.f32 1.5, %v1407_v42 }
 0x4d9   : > { %v2890_v44 = vpop.eup %2889 }
 0x4da   : > { %v1409_v46 = vmul.f32 %v2888_v38, %v1408_v43  ;;  %v1417_v47 = vmul.f32 %v2890_v44, %v1403_v39 }
 0x4dc   : > { %v1410_v48 = vmul.f32 %v1409_v46, %v1402_v35  ;;  %v1418_v50 = vmul.f32 %v2890_v44, %v1417_v47 }
 0x4de   : > { %v1412_v52 = vsel %vm1411_vm2, %v1402_v35, %v1410_v48  ;;  %v1419_v53 = vmul.f32 0.5, %v1418_v50  ;;  %v2867_v48 = vld [vmem:[%s3998_s9] ss:$0 sm:$0xff] }
 0x4df   : > { %v1415_v54 = vsel %vm1413_vm3, %v1414_v51, %v1412_v52 }
 0x4e0   : > { %v1430_v55 = vmul.f32 %v1428_v49, %v1415_v54  ;;  %v1420_v56 = vsub.f32 1.5, %v1419_v53 }
 0x4e2   : > { %v3598_v58 = vadd.f32 %v1430_v55, %v780_v45  ;;  %v1421_v59 = vmul.f32 %v2890_v44, %v1420_v56 }
 0x4e4   : > { %v1434_v60 = vsel %vm791_vm9, %v3598_v58, 0.0  ;;  %1647 = vst.msk [vmem:[%s3605_s26] sm:$0xff] %vm1319_vm13, %v3598_v58  ;;  %v1422_v61 = vmul.f32 %v1421_v59, %v1403_v39  ;;  %vm802_vm9 = vcmp.lt.s32.totalorder %v3555_v23, %v3558_v31 }
 0x4e5   : > { %v1436_v63 = vsel %vm1319_vm13, %v1434_v60, 0.0  ;;  %v2629_v7 = vsel %vm802_vm9, 1.0, %v3202_v6  ;;  %2632 = vmatpush.msk.msrb.mxu3 %vm802_vm9, %v3203_v20  ;;  %2630 = vmatpush.msk.msrb.mxu0 %vm802_vm9, %v3203_v20 }
 0x4e6   : > { %1437 = vadd.xlane.f32.xlu0 %v1436_v63  ;;  %v1424_v1 = vsel %vm1423_vm4, %v1403_v39, %v1422_v61  ;;  %v1499_v8 = vsub.f32 %v2629_v7, %v2629_v7  ;;  %vm2307_vm4 = vcmask 523264  }
 0x4e7   : > { %v1427_v2 = vsel %vm1425_vm5, %v1426_v0, %v1424_v1  ;;  %2633 = vmatpush.msk.msrb.mxu3 %vm801_vm6, %v3203_v20  ;;  %2631 = vmatpush.msk.msrb.mxu0 %vm801_vm6, %v3203_v20 }
 0x4e8   : > { %v1431_v3 = vmul.f32 %v1429_v62, %v1427_v2  ;;  %v1500_v9 = vand.u32 4294901760, %v1499_v8  ;;  %1531 = vmatpush.msrb.mxu2 %v1499_v8 }
 0x4ea   : > { %v3611_v22 = vadd.f32 %v1431_v3, %v781_v57  ;;  %v1501_v12 = vsub.f32 %v1499_v8, %v1500_v9  ;;  %1534 = vmatpush.msrb.mxu2 %v1505_v11  ;;  %1583 = vmatpush.msra.mxu0 %v1500_v9 }
 0x4ec   : > { %v1435_v4 = vsel %vm792_vm15, %v3611_v22, 0.0  ;;  %1648 = vst.msk [vmem:[%s3605_s26 + $0x8] sm:$0xff] %vm1319_vm13, %v3611_v22  ;;  %v1502_v14 = vand.u32 4294901760, %v1501_v12  ;;  %1679 = vmatpush.bf16.msra.mxu2 %v2730_v25  ;;  %1587 = vmatpush.msra.mxu0 %v1506_v13  ;;  %vm1453_vm15 = vcmask 130112  }
 0x4ed   : > { %v1439_v5 = vsel %vm1319_vm13, %v1435_v4, 0.0 }
 0x4ee   : > { %1440 = vadd.xlane.f32.xlu0 %v1439_v5  ;;  %1503 = vmatpush.msra.mxu1 %v1502_v14 }
 0x4f0   : > { %1509 = vmatpush.msra.mxu1 %v1508_v16  ;;  %1680 = vmatpush.bf16.msra.mxu2 %v2729_v27 }
 0x4f2   : > { %2634 = vmatpush.msk.msrb.mxu1 %vm802_vm9, %v3203_v20 }
 0x4f4   : > { %2635 = vmatpush.msk.msrb.mxu1 %vm801_vm6, %v3203_v20 }
 0x559   : > { %v1438_v28 = vpop.xlane.xlu0 %1437 }
 0x55a   : > { %v1442_v18 = vadd.f32 1e-09, %v1438_v28 }
 0x55c   : > { %2891 = vlog2.f32 %v1442_v18 }
 0x561   : > { %v1441_v29 = vpop.xlane.xlu0 %1440 }
 0x562   : > { %v1443_v32 = vadd.f32 1e-09, %v1441_v29  ;;  %v2892_v33 = vpop.eup %2891 }
 0x563   : > { %v1445_v26 = vmul.f32 0.6931472, %v2892_v33 }
 0x564   : > { %2893 = vlog2.f32 %v1443_v32 }
 0x565   : > { %v1450_v34 = vperm.slane %v1445_v26, %v3558_v31 }
 0x56a   : > { %v2894_v35 = vpop.eup %2893 }
 0x56b   : > { %v1447_v36 = vmul.f32 0.6931472, %v2894_v35 }
 0x56d   : > { %v1452_v38 = vperm.slane %v1447_v36, %v1451_v30 }
 0x56f   : > { %v1454_v39 = vsel %vm1453_vm15, %v1452_v38, %v1450_v34 }
 0x570   : > { %v1455_v40 = vsel %vm1319_vm13, %v1454_v39, 0 }
 0x571   : > { %v1475_v41 = vand.u32 4294901760, %v1455_v40 }
 0x573   : > { %1511 = vmatmul.f32.vlgmr.msra.gmra.mxu1 %v1475_v41  ;;  %v1476_v42 = vsub.f32 %v1455_v40, %v1475_v41 }
 0x575   : > { %1537 = vmatmul.f32.vlgmr.msrb.gmra.mxu2 %v1476_v42  ;;  %v1477_v43 = vand.u32 4294901760, %v1476_v42 }
 0x577   : > { %1562 = vmatmul.f32.vlgmr.msrb.gmra.mxu3 %v1477_v43  ;;  %v1478_v44 = vsub.f32 %v1476_v42, %v1477_v43 }
 0x579   : > { %v1479_v45 = vand.u32 4294901760, %v1478_v44 }
 0x57b   : > { %1480 = vmatmul.f32.vlgmr.msrb.gmra.mxu0 %v1479_v45  ;;  %1612 = vmatmul.f32.vlgmr.msrb.gmra.mxu1 %v1475_v41 }
 0x57d   : > { %2644 = vmatmul.msk.bf16.vlgmr.msra.gmra.mxu2 %vm807_vm0, %v1653_v24 }
 0x583   : > { %1589 = vmatmul.f32.vlgmr.msra.gmra.mxu0 %v1475_v41 }
 0x5f0   : > { %v1512_v50 = vpop.f32.mrf.mxu1 }
 0x5f8   : > { %v1538_v46 = vpop.f32.mrf.mxu2  ;;  %v1481_v49 = vpop.f32.mrf.mxu0 }
 0x5f9   : > { %v1513_v51 = vadd.f32 %v1512_v50, %v1481_v49  ;;  %v1613_v63 = vpop.f32.mrf.mxu1 }
 0x5fa   : > { %v1563_v59 = vpop.f32.mrf.mxu3 }
 0x5fb   : > { %v1539_v54 = vadd.f32 %v1538_v46, %v1513_v51 }
 0x5fd   : > { %v1564_v19 = vadd.f32 %v1563_v59, %v1539_v54 }
 0x600   : > { %v1682_v47 = vpop.f32.mrf.mxu2  ;;  %v1590_v17 = vpop.f32.mrf.mxu0 }
 0x601   : > { %v1683_v52 = vadd.f32 %v2867_v48, %v1682_v47  ;;  %v1591_v61 = vadd.f32 %v1590_v17, %v1564_v19 }
 0x603   : > { %v1687_v55 = vpack.c.bf16 %v1683_v52, %v1683_v52  ;;  %v1614_v0 = vadd.f32 %v1613_v63, %v1591_v61 }
 0x605   : > { %v1691_v24 = vunpack.c.l.b16 %v1687_v55  ;;  %v1616_v1 = vperm.slane %v1614_v0, 0 }
 0x608   : > { %v1684_v53 = vpop.f32.mrf.mxu2 }
 0x609   : > { %v1685_v56 = vadd.f32 %v2867_v48, %v1684_v53 }
 0x60b   : > { %v1688_v57 = vpack.c.bf16 %v1685_v56, %v1685_v56 }
 0x60d   : > { %v1692_v60 = vunpack.c.l.b16 %v1688_v57 }
 0x60f   : > { %v3665_v62 = vpack.c.b16 %v1692_v60, %v1691_v24 }
 0x611   : > { %1694 = vrot.lane.b32.xlu0 %v3665_v62, %s3201_s6  ;;  %s3206_s6 = smov 120  }
 0x619   : > { %1621 = vperm.xlu0 %2859, %v1616_v1  }
 0x621   : > { %2861 = vset.pattern.permute.xlu0 %v3555_v23 }
 0x683   : > { %v1695_v2 = vpop.permute.xlu0 %1694 }
 0x684   : > { %v1701_v3 = vsel %vm1696_vm7, %v1695_v2, 0 }
 0x685   : > { %1710 = vmatpush.bf16.xpose.msra.mxu3 %v1701_v3 }
 0x68b   : > { %v1622_v4 = vpop.permute.xlu0 %1621 }
 0x68c   : > { %v1629_v5 = vsub.f32 %v1616_v1, %v1622_v4  ;;  %2645 = vmatmul.msk.bf16.vlgmr.msra.gmra.mxu3 %vm1696_vm7, %v3665_v62 }
 0x68e   : > { %v1633_v6 = vsub.f32 0.0, %v1629_v5 }
 0x690   : > { %v1635_v7 = vsel %vm1631_vm10, %v1629_v5, %v1633_v6 }
 0x691   : > { %v1637_v8 = vmul.f32 1.442695, %v1635_v7 }
 0x693   : > { %2895 = vpow2.f32 %v1637_v8 }
 0x699   : > { %v2896_v37 = vpop.eup %2895 }
 0x69a   : > { %v1641_v9 = vadd.f32 1e-09, %v2896_v37 }
 0x69c   : > { %v3679_v11 = vsel %vm787_vm8, %v3598_v58, %v1641_v9  ;;  %vm1632_vm8 = vcmp.gt.s32.totalorder %v3558_v31, %v3555_v23  ;;  %v2732_v23 = vld [vmem:[#allocation7 + $0x8] sm:$0xff] }
 0x69d   : > { %1645 = vst.msk [vmem:[%s3682_s4] sm:$0xff] %vm1319_vm13, %v3679_v11  ;;  %v1912_v31 = vsel %vm1696_vm7, %v2732_v23, 0 }
 0x70f   : > { %v1712_v12 = vpop.f32.mrf.mxu3 }
 0x710   : > { %v1717_v13 = vsel %vm1319_vm13, %v1712_v12, -inf }
 0x711   : > { %1718 = vmax.xlane.f32.xlu2 %v1717_v13 }
 0x717   : > { %v1714_v14 = vpop.f32.mrf.mxu3 }
 0x718   : > { %v1720_v15 = vsel %vm1319_vm13, %v1714_v14, -inf }
 0x719   : > { %1721 = vmax.xlane.f32.xlu2 %v1720_v15 }
 0x731   : > { %1627 = vperm.xlu2 %2860, %v1616_v1  }
 0x739   : > { %1751 = vrot.lane.b32.xlu2 %v3665_v62, %s3204_s5 }
 0x741   : > { %1778 = vrot.lane.b32.xlu2 %v3665_v62, %s3205_s18  ;;  %s3722_s18 = scalar_lea.vmem %s3949_s21, %s2728_s1 }
 0x749   : > { %1776 = vrot.lane.b32.xlu2 %v3665_v62, %s3206_s6 }
 0x751   : > { %1930 = vrot.lane.b32.xlu2 %v3665_v62, %s3207_s24  ;;  %s3213_s24 = smov 40  }
 0x759   : > { %2051 = vrot.lane.b32.xlu2 %v3665_v62, %s3208_s29 }
 0x761   : > { %2049 = vrot.lane.b32.xlu2 %v3665_v62, %s3209_s22 }
 0x784   : > { %v1719_v21 = vpop.xlane.xlu2 %1718 }
 0x785   : > { %v1723_v58 = vsub.f32 %v1712_v12, %v1719_v21 }
 0x787   : > { %v1725_v16 = vmul.f32 1.442695, %v1723_v58 }
 0x789   : > { %2897 = vpow2.f32 %v1725_v16 }
 0x78c   : > { %v1722_v20 = vpop.xlane.xlu2 %1721 }
 0x78d   : > { %v1724_v25 = vsub.f32 %v1714_v14, %v1722_v20 }
 0x78f   : > { %v2898_v27 = vpop.eup %2897  ;;  %v1727_v28 = vmul.f32 1.442695, %v1724_v25 }
 0x790   : > { %v1729_v18 = vsel %vm1319_vm13, %v2898_v27, 0.0 }
 0x791   : > { %2899 = vpow2.f32 %v1727_v28  ;;  %1730 = vadd.xlane.f32.xlu0 %v1729_v18 }
 0x794   : > { %v1628_v29 = vpop.permute.xlu2 %1627 }
 0x795   : > { %v1630_v32 = vsub.f32 %v1616_v1, %v1628_v29 }
 0x797   : > { %v2900_v33 = vpop.eup %2899  ;;  %v1634_v26 = vsub.f32 0.0, %v1630_v32 }
 0x798   : > { %v1732_v30 = vsel %vm1319_vm13, %v2900_v33, 0.0 }
 0x799   : > { %v1636_v35 = vsel %vm1632_vm8, %v1630_v32, %v1634_v26  ;;  %1733 = vadd.xlane.f32.xlu1 %v1732_v30 }
 0x79a   : > { %v1639_v36 = vmul.f32 1.442695, %v1636_v35 }
 0x79c   : > { %2901 = vpow2.f32 %v1639_v36  ;;  %v1752_v34 = vpop.permute.xlu2 %1751 }
 0x79d   : > { %1764 = vmatpush.bf16.msrb.mxu0 %v1752_v34 }
 0x7a1   : > { %1920 = vmatpush.bf16.xpose.msra.mxu0 %v1912_v31 }
 0x7a2   : > { %v2902_v38 = vpop.eup %2901 }
 0x7a3   : > { %v1642_v39 = vadd.f32 1e-09, %v2902_v38 }
 0x7a4   : > { %v1779_v40 = vpop.permute.xlu2 %1778 }
 0x7a5   : > { %v3705_v41 = vsel %vm788_vm14, %v3611_v22, %v1642_v39  ;;  %v1784_v42 = vsel %vm1696_vm7, %v1779_v40, 0  ;;  %1928 = vrot.lane.b32.xlu0 %v3665_v62, %s3210_s2  ;;  %v2731_v22 = vld [vmem:[#allocation7] sm:$0xff]  ;;  %vm1743_vm14 = vcmask 125952  }
 0x7a6   : > { %1793 = vmatpush.bf16.xpose.msra.mxu1 %v1784_v42  ;;  %1646 = vst.msk [vmem:[%s3682_s4 + $0x8] sm:$0xff] %vm1319_vm13, %v3705_v41  ;;  %v1909_v46 = vsel %vm1696_vm7, %v2731_v22, 0 }
 0x7a9   : > { %1921 = vmatpush.bf16.xpose.msra.mxu0 %v1909_v46 }
 0x7ac   : > { %v1777_v43 = vpop.permute.xlu2 %1776 }
 0x7ad   : > { %2647 = vmatmul.msk.bf16.vlgmr.msra.gmra.mxu1 %vm1696_vm7, %v1777_v43 }
 0x7b4   : > { %v1931_v44 = vpop.permute.xlu2 %1930 }
 0x7b5   : > { %v1936_v45 = vsel %vm1696_vm7, %v1931_v44, 0 }
 0x7b6   : > { %1945 = vmatpush.bf16.xpose.msrb.mxu1 %v1936_v45 }
 0x7bc   : > { %v2052_v19 = vpop.permute.xlu2 %2051 }
 0x7bd   : > { %v2057_v60 = vsel %vm1696_vm7, %v2052_v19, 0 }
 0x7c4   : > { %v2050_v4 = vpop.permute.xlu2 %2049 }
 0x804   : > { %v1731_v47 = vpop.xlane.xlu0 %1730 }
 0x805   : > { %2903 = vrcp.f32 %v1731_v47 }
 0x80b   : > { %v2904_v48 = vpop.eup %2903 }
 0x80c   : > { %v1737_v49 = vmul.f32 %v2904_v48, %v2898_v27  ;;  %v1734_v50 = vpop.xlane.xlu1 %1733 }
 0x80d   : > { %2905 = vrcp.f32 %v1734_v50 }
 0x80e   : > { %v1739_v51 = vmul.f32 %v1737_v49, %v3679_v11 }
 0x810   : > { %v1741_v52 = vpack.c.bf16 %v1739_v51, %v1739_v51 }
 0x812   : > { %1744 = vst.msk [vmem:[%s3722_s18] sm:$0xf] %vm1743_vm14, %v1741_v52  ;;  %v1748_v59 = vunpack.c.l.b16 %v1741_v52 }
 0x813   : > { %v2906_v53 = vpop.eup %2905 }
 0x814   : > { %v1738_v54 = vmul.f32 %v2906_v53, %v2900_v33 }
 0x816   : > { %v1740_v55 = vmul.f32 %v1738_v54, %v3705_v41 }
 0x817   : > { %v1929_v56 = vpop.permute.xlu0 %1928 }
 0x818   : > { %v1742_v57 = vpack.c.bf16 %v1740_v55, %v1740_v55  ;;  %2667 = vmatmul.msk.bf16.vlgmr.msrb.gmra.mxu1 %vm1696_vm7, %v1929_v56 }
 0x81a   : > { %1745 = vst.msk [vmem:[%s3722_s18 + $0x4] sm:$0xf] %vm1743_vm14, %v1742_v57  ;;  %v1749_v17 = vunpack.c.l.b16 %v1742_v57  ;;  %v2734_v57 = vld [vmem:[#allocation7 + $0x8] sm:$0xff] }
 0x81c   : > { %v1750_v24 = vpack.c.b16 %v1749_v17, %v1748_v59 }
 0x81e   : > { %2646 = vmatmul.msk.bf16.vlgmr.msrb.gmra.mxu0 %vm1319_vm13, %v1750_v24 }
 0x81f   : > { %2066 = vmatpush.bf16.xpose.msrb.mxu0 %v2057_v60  ;;  %v2733_v60 = vld [vmem:[#allocation7] sm:$0xff] }
 0x82a   : > { %v1795_v61 = vpop.f32.mrf.mxu1 }
 0x82b   : > { %v1800_v63 = vsel %vm1319_vm13, %v1795_v61, -inf }
 0x82c   : > { %1801 = vmax.xlane.f32.xlu2 %v1800_v63 }
 0x832   : > { %v1797_v0 = vpop.f32.mrf.mxu1 }
 0x833   : > { %v1803_v1 = vsel %vm1319_vm13, %v1797_v0, -inf }
 0x834   : > { %1804 = vmax.xlane.f32.xlu0 %v1803_v1 }
 0x895   : > { %v1947_v2 = vpop.f32.mrf.mxu1 }
 0x896   : > { %v1952_v3 = vsel %vm1319_vm13, %v1947_v2, -inf }
 0x897   : > { %1953 = vmax.xlane.f32.xlu1 %v1952_v3 }
 0x89b   : > { %v1766_v5 = vpop.f32.mrf.mxu0 }
 0x89d   : > { %v1949_v6 = vpop.f32.mrf.mxu1 }
 0x89e   : > { %v1955_v7 = vsel %vm1319_vm13, %v1949_v6, -inf }
 0x89f   : > { %v1802_v8 = vpop.xlane.xlu2 %1801  ;;  %1956 = vmax.xlane.f32.xlu2 %v1955_v7 }
 0x8a0   : > { %v1806_v37 = vsub.f32 %v1795_v61, %v1802_v8 }
 0x8a2   : > { %v1808_v9 = vmul.f32 1.442695, %v1806_v37 }
 0x8a3   : > { %v1768_v12 = vpop.f32.mrf.mxu0 }
 0x8a4   : > { %2907 = vpow2.f32 %v1808_v9  ;;  %v1771_v13 = vpack.c.bf16 %v1768_v12, %v1766_v5 }
 0x8a6   : > { %2666 = vmatmul.msk.bf16.vlgmr.msra.gmra.mxu0 %vm1696_vm7, %v1771_v13 }
 0x8a7   : > { %v1805_v33 = vpop.xlane.xlu0 %1804 }
 0x8a8   : > { %v1807_v30 = vsub.f32 %v1797_v0, %v1805_v33 }
 0x8aa   : > { %v2908_v14 = vpop.eup %2907  ;;  %v1810_v34 = vmul.f32 1.442695, %v1807_v30 }
 0x8ab   : > { %v1812_v15 = vsel %vm1319_vm13, %v2908_v14, 0.0 }
 0x8ac   : > { %1813 = vadd.xlane.f32.xlu2 %v1812_v15 }
 0x8b6   : > { %2678 = vmatmul.msk.bf16.vlgmr.msrb.gmra.mxu0 %vm1696_vm7, %v2050_v4 }
 0x90a   : > { %v1954_v21 = vpop.xlane.xlu1 %1953 }
 0x90b   : > { %v1958_v58 = vsub.f32 %v1947_v2, %v1954_v21  ;;  %v2736_v21 = vld [vmem:[#allocation7 + $0x8] sm:$0xff] }
 0x90d   : > { %v1960_v16 = vmul.f32 1.442695, %v1958_v58  ;;  %v2735_v58 = vld [vmem:[#allocation7] sm:$0xff] }
 0x90f   : > { %2909 = vpow2.f32 %v1960_v16 }
 0x912   : > { %v1957_v27 = vpop.xlane.xlu2 %1956 }
 0x913   : > { %v1959_v38 = vsub.f32 %v1949_v6, %v1957_v27 }
 0x915   : > { %v2910_v20 = vpop.eup %2909  ;;  %v1962_v42 = vmul.f32 1.442695, %v1959_v38 }
 0x916   : > { %v1964_v25 = vsel %vm1319_vm13, %v2910_v20, 0.0 }
 0x917   : > { %1965 = vadd.xlane.f32.xlu2 %v1964_v25 }
 0x91f   : > { %v1814_v28 = vpop.xlane.xlu2 %1813 }
 0x920   : > { %2911 = vrcp.f32 %v1814_v28 }
 0x921   : > { %2913 = vpow2.f32 %v1810_v34 }
 0x922   : > { %2915 = vpow2.f32 %v1962_v42 }
 0x923   : > { %v3740_v18 = vpop.f32.mrf.mxu0 }
 0x926   : > { %v2912_v29 = vpop.eup %2911 }
 0x927   : > { %v1820_v32 = vmul.f32 %v2912_v29, %v2908_v14  ;;  %v2914_v43 = vpop.eup %2913  ;;  %v2737_v29 = vld [vmem:[#allocation7] sm:$0xff] }
 0x928   : > { %v1815_v23 = vsel %vm1319_vm13, %v2914_v43, 0.0  ;;  %v2916_v31 = vpop.eup %2915 }
 0x929   : > { %v1822_v26 = vmul.f32 %v1820_v32, %v3679_v11  ;;  %v1967_v22 = vsel %vm1319_vm13, %v2916_v31, 0.0 }
 0x92b   : > { %v3743_v35 = vpack.c.bf16 %v1822_v26, %v1822_v26  ;;  %v3745_v36 = vpop.f32.mrf.mxu0 }
 0x92d   : > { %1826 = vst.msk [vmem:[%s3722_s18 + $0x8] sm:$0xf] %vm1743_vm14, %v3743_v35  ;;  %v1830_v12 = vunpack.c.l.b16 %v3743_v35 }
 0x933   : > { %v2068_v39 = vpop.f32.mrf.mxu0 }
 0x934   : > { %v2073_v40 = vsel %vm1319_vm13, %v2068_v39, -inf }
 0x935   : > { %2074 = vmax.xlane.f32.xlu0 %v2073_v40  ;;  %v2738_v40 = vld [vmem:[#allocation7 + $0x8] sm:$0xff] }
 0x93b   : > { %v2070_v44 = vpop.f32.mrf.mxu0 }
 0x93c   : > { %v2076_v45 = vsel %vm1319_vm13, %v2070_v44, -inf }
 0x93d   : > { %2077 = vmax.xlane.f32.xlu1 %v2076_v45  ;;  %1816 = vadd.xlane.f32.xlu0 %v1815_v23 }
 0x945   : > { %1968 = vadd.xlane.f32.xlu0 %v1967_v22 }
 0x956   : > { %1833 = vrot.lane.b32.xlu1 %v3665_v62, %s3211_s14  ;;  %s2379_s14 = scalar_lea.hbm %s3947_s19, %s3839_s17 }
 0x957   : > { %s2382_s29 = sshll.u32 %s2379_s14, 4  ;;  %s2383_s29 = int_to_ptr.hbm [resolvable:$true] %s2382_s29 }
 0x95e   : > { %1870 = vrot.lane.b32.xlu1 %v2734_v57, %s3206_s6 }
 0x966   : > { %1868 = vrot.lane.b32.xlu1 %v2733_v60, %s3206_s6  ;;  %s3212_s6 = smov 48  }
 0x96e   : > { %2020 = vrot.lane.b32.xlu1 %v2735_v58, %s3210_s2 }
 0x98a   : > { %v1966_v46 = vpop.xlane.xlu2 %1965 }
 0x98b   : > { %2917 = vrcp.f32 %v1966_v46 }
 0x991   : > { %v2918_v47 = vpop.eup %2917 }
 0x992   : > { %v1972_v48 = vmul.f32 %v2918_v47, %v2910_v20 }
 0x994   : > { %v1974_v49 = vmul.f32 %v1972_v48, %v3679_v11 }
 0x996   : > { %v1976_v50 = vpack.c.bf16 %v1974_v49, %v1974_v49 }
 0x998   : > { %1978 = vst.msk [vmem:[%s3722_s18 + $0x10] sm:$0xf] %vm1743_vm14, %v1976_v50  ;;  %v1982_v8 = vunpack.c.l.b16 %v1976_v50 }
 0x9a8   : > { %v2075_v51 = vpop.xlane.xlu0 %2074 }
 0x9a9   : > { %v2079_v52 = vsub.f32 %v2068_v39, %v2075_v51 }
 0x9ab   : > { %v2081_v53 = vmul.f32 1.442695, %v2079_v52 }
 0x9ad   : > { %2919 = vpow2.f32 %v2081_v53 }
 0x9b0   : > { %v2078_v54 = vpop.xlane.xlu1 %2077  ;;  %v1817_v55 = vpop.xlane.xlu0 %1816 }
 0x9b1   : > { %v2080_v56 = vsub.f32 %v2070_v44, %v2078_v54  ;;  %2921 = vrcp.f32 %v1817_v55 }
 0x9b3   : > { %v2920_v59 = vpop.eup %2919  ;;  %v2083_v17 = vmul.f32 1.442695, %v2080_v56 }
 0x9b4   : > { %v2085_v19 = vsel %vm1319_vm13, %v2920_v59, 0.0 }
 0x9b5   : > { %2923 = vpow2.f32 %v2083_v17  ;;  %2086 = vadd.xlane.f32.xlu2 %v2085_v19 }
 0x9b7   : > { %v2922_v24 = vpop.eup %2921 }
 0x9b8   : > { %v1821_v61 = vmul.f32 %v2922_v24, %v2914_v43  ;;  %v1969_v63 = vpop.xlane.xlu0 %1968 }
 0x9b9   : > { %2925 = vrcp.f32 %v1969_v63 }
 0x9ba   : > { %v1823_v0 = vmul.f32 %v1821_v61, %v3705_v41 }
 0x9bb   : > { %v2924_v1 = vpop.eup %2923 }
 0x9bc   : > { %v1825_v2 = vpack.c.bf16 %v1823_v0, %v1823_v0  ;;  %v2088_v3 = vsel %vm1319_vm13, %v2924_v1, 0.0 }
 0x9bd   : > { %2089 = vadd.xlane.f32.xlu0 %v2088_v3 }
 0x9be   : > { %1827 = vst.msk [vmem:[%s3722_s18 + $0xc] sm:$0xf] %vm1743_vm14, %v1825_v2  ;;  %v1831_v37 = vunpack.c.l.b16 %v1825_v2  ;;  %v2935_v2 = vld [vmem:[%s3470_s0] sm:$0xff] }
 0x9bf   : > { %v2926_v4 = vpop.eup %2925 }
 0x9c0   : > { %v1973_v5 = vmul.f32 %v2926_v4, %v2916_v31  ;;  %v1832_v15 = vpack.c.b16 %v1831_v37, %v1830_v12 }
 0x9c2   : > { %v1975_v6 = vmul.f32 %v1973_v5, %v3705_v41 }
 0x9c4   : > { %v1977_v7 = vpack.c.bf16 %v1975_v6, %v1975_v6 }
 0x9c6   : > { %1979 = vst.msk [vmem:[%s3722_s18 + $0x14] sm:$0xf] %vm1743_vm14, %v1977_v7  ;;  %v1983_v9 = vunpack.c.l.b16 %v1977_v7 }
 0x9c8   : > { %v1834_v13 = vpop.permute.xlu1 %1833  ;;  %v1984_v14 = vpack.c.b16 %v1983_v9, %v1982_v8  ;;  %v2936_v9 = vld [vmem:[%s3470_s0 + $0x8] sm:$0xff]  ;;  %s3071_s0 = sshra.s32 %s2383_s29, 4  ;;  %s3072_s0 = int_to_ptr.hbm [resolvable:$true] %s3071_s0 }
 0x9c9   : > { %1846 = vmatpush.bf16.msrb.mxu2 %v1834_v13  ;;  %p3078_p9 = scmp.lt.s32.totalorder %s3072_s0, %s3947_s19 }
 0x9cc   : > { %2648 = vmatmul.msk.bf16.vlgmr.msrb.gmra.mxu2 %vm1319_vm13, %v1832_v15 }
 0x9cd   : > { %1985 = vrot.lane.b32.xlu2 %v3665_v62, %s3212_s6  ;;  %s2340_s6 = sand.u32 1, %s3347_s3  }
 0x9d0   : > { %v1871_v16 = vpop.permute.xlu1 %1870 }
 0x9d1   : > { %2106 = vrot.lane.b32.xlu0 %v3665_v62, %s3213_s24  ;;  %v1879_v25 = vsel %vm1696_vm7, %v1871_v16, 0  ;;  %s2380_s24 = sshll.u32 %s3682_s4, 4  ;;  %s2381_s24 = int_to_ptr.vmem [resolvable:$true] %s2380_s24 }
 0x9d2   : > { %1887 = vmatpush.bf16.xpose.msrb.mxu3 %v1879_v25 }
 0x9d5   : > { %2143 = vrot.lane.b32.xlu2 %v2738_v40, %s3209_s22 }
 0x9d8   : > { %v1869_v28 = vpop.permute.xlu1 %1868 }
 0x9d9   : > { %2022 = vrot.lane.b32.xlu0 %v2736_v21, %s3210_s2  ;;  %v1876_v62 = vsel %vm1696_vm7, %v1869_v28, 0  ;;  %s3073_s2 = scalar_lea.hbm %s3072_s0, 16 }
 0x9da   : > { %1888 = vmatpush.bf16.xpose.msrb.mxu3 %v1876_v62  ;;  %p3074_p1 = scmp.ne.s32.totalorder %s3072_s0, %s3073_s2  ;;  %p3079_p2 = scmp.lt.s32.totalorder %s3077_s8, %s3073_s2 }
 0x9dc   : > { %p3075_p4 = pnand %p3074_p1, %p3413_p3  ;;  %p3080_p10 = por %p3079_p2, %p3078_p9 }
 0x9de   : > { %p3076_p11 = pneg %p3075_p4 }
 0x9e0   : > { %v2021_v48 = vpop.permute.xlu1 %2020  ;;  %p3081_p12 = pnand %p3080_p10, %p3076_p11 }
 0x9e1   : > { %2141 = vrot.lane.b32.xlu0 %v2737_v29, %s3209_s22  ;;  %v2028_v50 = vsel %vm1696_vm7, %v2021_v48, 0  ;;  %s3847_s22 = scalar_lea.sflag [#allocation12], %s2340_s6 }
 0xa28   : > { %v2087_v20 = vpop.xlane.xlu2 %2086 }
 0xa29   : > { %2927 = vrcp.f32 %v2087_v20 }
 0xa2f   : > { %v2928_v27 = vpop.eup %2927 }
 0xa30   : > { %v2093_v32 = vmul.f32 %v2928_v27, %v2920_v59  ;;  %v1986_v33 = vpop.permute.xlu2 %1985  ;;  %v2090_v26 = vpop.xlane.xlu0 %2089 }
 0xa31   : > { %2929 = vrcp.f32 %v2090_v26  ;;  %1998 = vmatpush.bf16.msra.mxu2 %v1986_v33 }
 0xa32   : > { %v2095_v30 = vmul.f32 %v2093_v32, %v3679_v11  ;;  %v2740_v32 = vld [vmem:[#allocation8 + $0x8] sm:$0xff] }
 0xa34   : > { %v2097_v35 = vpack.c.bf16 %v2095_v30, %v2095_v30  ;;  %2668 = vmatmul.msk.bf16.vlgmr.msra.gmra.mxu2 %vm1319_vm13, %v1984_v14  ;;  %v2739_v30 = vld [vmem:[#allocation8] sm:$0xff] }
 0xa36   : > { %2099 = vst.msk [vmem:[%s3722_s18 + $0x18] sm:$0xf] %vm1743_vm14, %v2097_v35  ;;  %v2103_v44 = vunpack.c.l.b16 %v2097_v35 }
 0xa37   : > { %v2930_v34 = vpop.eup %2929 }
 0xa38   : > { %v2094_v38 = vmul.f32 %v2930_v34, %v2924_v1  ;;  %v2144_v47 = vpop.permute.xlu2 %2143  ;;  %v2868_v1 = vld [vmem:[%s3939_s11] ss:$0 sm:$0xff] }
 0xa39   : > { %v2152_v49 = vsel %vm1696_vm7, %v2144_v47, 0 }
 0xa3a   : > { %v2096_v39 = vmul.f32 %v2094_v38, %v3705_v41  ;;  %2160 = vmatpush.bf16.xpose.msrb.mxu2 %v2152_v49 }
 0xa3c   : > { %v2098_v42 = vpack.c.bf16 %v2096_v39, %v2096_v39 }
 0xa3e   : > { %2100 = vst.msk [vmem:[%s3722_s18 + $0x1c] sm:$0xf] %vm1743_vm14, %v2098_v42  ;;  %v2104_v43 = vunpack.c.l.b16 %v2098_v42 }
 0xa40   : > { %v2105_v45 = vpack.c.b16 %v2104_v43, %v2103_v44 }
 0xa43   : > { %v2107_v11 = vpop.permute.xlu0 %2106 }
 0xa44   : > { %2119 = vmatpush.bf16.msra.mxu1 %v2107_v11 }
 0xa47   : > { %2679 = vmatmul.msk.bf16.vlgmr.msra.gmra.mxu1 %vm1319_vm13, %v2105_v45 }
 0xa4b   : > { %v2023_v46 = vpop.permute.xlu0 %2022 }
 0xa4c   : > { %v2031_v41 = vsel %vm1696_vm7, %v2023_v46, 0 }
 0xa4d   : > { %2039 = vmatpush.bf16.xpose.msra.mxu3 %v2031_v41 }
 0xa4f   : > { %v1848_v23 = vpop.f32.mrf.mxu2 }
 0xa53   : > { %v2142_v51 = vpop.permute.xlu0 %2141 }
 0xa54   : > { %v2149_v52 = vsel %vm1696_vm7, %v2142_v51, 0 }
 0xa55   : > { %2040 = vmatpush.bf16.xpose.msra.mxu3 %v2028_v50  ;;  %2161 = vmatpush.bf16.xpose.msrb.mxu2 %v2149_v52  ;;  %v2870_v50 = vld [vmem:[%s3941_s13] ss:$0 sm:$0xff] }
 0xa57   : > { %v1850_v31 = vpop.f32.mrf.mxu2 }
 0xa58   : > { %v1853_v22 = vpack.c.bf16 %v1850_v31, %v1848_v23 }
 0xa5a   : > { %2657 = vmatmul.msk.bf16.vlgmr.msrb.gmra.mxu3 %vm1696_vm7, %v1853_v22 }
 0xa5d   : > { %2264 = vmatpush.bf16.msrb.mxu3 %v2740_v32 }
 0xa61   : > { %2265 = vmatpush.bf16.msrb.mxu3 %v2739_v30 }
 0xab7   : > { %v2000_v53 = vpop.f32.mrf.mxu2 }
 0xabf   : > { %v2002_v54 = vpop.f32.mrf.mxu2 }
 0xac0   : > { %v2005_v55 = vpack.c.bf16 %v2002_v54, %v2000_v53 }
 0xac2   : > { %2677 = vmatmul.msk.bf16.vlgmr.msra.gmra.mxu3 %vm1696_vm7, %v2005_v55 }
 0xac4   : > { %v2121_v56 = vpop.f32.mrf.mxu1 }
 0xacc   : > { %v2123_v57 = vpop.f32.mrf.mxu1 }
 0xacd   : > { %v2126_v59 = vpack.c.bf16 %v2123_v57, %v2121_v56  ;;  %v2744_v57 = vld [vmem:[%s3944_s16 + $0x18] sm:$0xff] }
 0xace   : > { %2315 = vmatpush.bf16.msra.mxu0 %v2744_v57 }
 0xacf   : > { %2688 = vmatmul.msk.bf16.vlgmr.msrb.gmra.mxu2 %vm1696_vm7, %v2126_v59  ;;  %v2743_v59 = vld [vmem:[%s3944_s16 + $0x10] sm:$0xff] }
 0xad2   : > { %2316 = vmatpush.bf16.msra.mxu0 %v2743_v59 }
 0xadd   : > { %v1890_v17 = vpop.f32.mrf.mxu3 }
 0xade   : > { %v1924_v60 = vadd.f32 %v3740_v18, %v1890_v17  ;;  %v2742_v17 = vld [vmem:[%s3944_s16 + $0x8] sm:$0xff] }
 0xadf   : > { %2317 = vmatpush.bf16.msra.mxu0 %v2742_v17 }
 0xae5   : > { %v1892_v19 = vpop.f32.mrf.mxu3 }
 0xae6   : > { %v1926_v5 = vadd.f32 %v3745_v36, %v1892_v19  ;;  %v2741_v19 = vld [vmem:[%s3944_s16] sm:$0xff] }
 0xae7   : > { %2318 = vmatpush.bf16.msra.mxu0 %v2741_v19 }
 0xb45   : > { %v2042_v24 = vpop.f32.mrf.mxu3 }
 0xb46   : > { %v2047_v61 = vadd.f32 %v2042_v24, %v1924_v60  ;;  %v2871_v60 = vld [vmem:[%s3943_s15] ss:$0 sm:$0xff] }
 0xb4d   : > { %v2044_v4 = vpop.f32.mrf.mxu3 }
 0xb4e   : > { %v2048_v7 = vadd.f32 %v2044_v4, %v1926_v5 }
 0xb52   : > { %v2163_v63 = vpop.f32.mrf.mxu2 }
 0xb53   : > { %v2168_v0 = vadd.f32 %v2163_v63, %v2047_v61 }
 0xb55   : > { %v2170_v3 = vadd.f32 %v2935_v2, %v2168_v0 }
 0xb57   : > { %v3799_v6 = vadd.f32 %v2868_v1, %v2170_v3 }
 0xb59   : > { %v2180_v8 = vsel %vm807_vm0, %v3799_v6, 0.0 }
 0xb5a   : > { %2181 = vadd.xlane.f32.xlu2 %v2180_v8  ;;  %v2165_v18 = vpop.f32.mrf.mxu2 }
 0xb5b   : > { %v2169_v37 = vadd.f32 %v2165_v18, %v2048_v7 }
 0xb5d   : > { %v2171_v12 = vadd.f32 %v2936_v9, %v2169_v37 }
 0xb5f   : > { %v3804_v13 = vadd.f32 %v2868_v1, %v2171_v12 }
 0xb61   : > { %v2183_v14 = vsel %vm807_vm0, %v3804_v13, 0.0 }
 0xb62   : > { %2184 = vadd.xlane.f32.xlu1 %v2183_v14 }
 0xbcd   : > { %v2182_v15 = vpop.xlane.xlu2 %2181 }
 0xbce   : > { %v2186_v36 = vmul.f32 %v2182_v15, %v3476_v10 }
 0xbd0   : > { %v2188_v21 = vsub.f32 %v3799_v6, %v2186_v36 }
 0xbd2   : > { %v2190_v58 = vmul.f32 %v2188_v21, %v2188_v21 }
 0xbd4   : > { %v2192_v16 = vsel %vm807_vm0, %v2190_v58, 0.0 }
 0xbd5   : > { %2193 = vadd.xlane.f32.xlu0 %v2192_v16  ;;  %v2185_v20 = vpop.xlane.xlu1 %2184 }
 0xbd6   : > { %v2187_v25 = vmul.f32 %v2185_v20, %v3476_v10 }
 0xbd8   : > { %v2189_v27 = vsub.f32 %v3804_v13, %v2187_v25 }
 0xbda   : > { %v2191_v28 = vmul.f32 %v2189_v27, %v2189_v27 }
 0xbdc   : > { %v2195_v29 = vsel %vm807_vm0, %v2191_v28, 0.0 }
 0xbdd   : > { %2196 = vadd.xlane.f32.xlu2 %v2195_v29 }
 0xc48   : > { %v2194_v33 = vpop.xlane.xlu0 %2193 }
 0xc49   : > { %v2198_v26 = vmul.f32 %v2194_v33, %v3476_v10 }
 0xc4b   : > { %v2200_v62 = vadd.f32 1e-05, %v2198_v26 }
 0xc4d   : > { %2931 = vrsqrt.f32 %v2200_v62  ;;  %vm2208_vm11 = vweird.f32 %v2200_v62 }
 0xc50   : > { %v2197_v35 = vpop.xlane.xlu2 %2196 }
 0xc51   : > { %v2199_v34 = vmul.f32 %v2197_v35, %v3476_v10  ;;  %v2869_v10 = vld [vmem:[%s3940_s12] ss:$0 sm:$0xff] }
 0xc53   : > { %v2932_v38 = vpop.eup %2931  ;;  %v2201_v39 = vadd.f32 1e-05, %v2199_v34 }
 0xc54   : > { %v2203_v40 = vmul.f32 %v2932_v38, %v2200_v62  ;;  %vm2209_vm13 = vweird.f32 %v2932_v38 }
 0xc55   : > { %2933 = vrsqrt.f32 %v2201_v39  ;;  %vm2210_vm12 = vmor %vm2208_vm11, %vm2209_vm13  ;;  %vm2218_vm2 = vweird.f32 %v2201_v39 }
 0xc56   : > { %v2204_v42 = vmul.f32 %v2932_v38, %v2203_v40 }
 0xc58   : > { %v2205_v43 = vmul.f32 0.5, %v2204_v42 }
 0xc5a   : > { %v2206_v44 = vsub.f32 1.5, %v2205_v43 }
 0xc5b   : > { %v2934_v11 = vpop.eup %2933 }
 0xc5c   : > { %v2207_v45 = vmul.f32 %v2932_v38, %v2206_v44  ;;  %v2213_v23 = vmul.f32 %v2934_v11, %v2201_v39  ;;  %vm2219_vm1 = vweird.f32 %v2934_v11 }
 0xc5d   : > { %vm2220_vm3 = vmor %vm2218_vm2, %vm2219_vm1 }
 0xc5e   : > { %v2214_v31 = vmul.f32 %v2934_v11, %v2213_v23  ;;  %v2211_v22 = vsel %vm2210_vm12, %v2932_v38, %v2207_v45 }
 0xc5f   : > { %v2222_v47 = vmul.f32 %v2211_v22, %v2188_v21 }
 0xc60   : > { %v2215_v46 = vmul.f32 0.5, %v2214_v31 }
 0xc61   : > { %v2227_v51 = vmul.f32 %v2869_v10, %v2222_v47 }
 0xc62   : > { %v2216_v41 = vsub.f32 1.5, %v2215_v46 }
 0xc63   : > { %v2232_v54 = vadd.f32 %v2870_v50, %v2227_v51 }
 0xc64   : > { %v2217_v48 = vmul.f32 %v2934_v11, %v2216_v41 }
 0xc66   : > { %v2221_v49 = vsel %vm2220_vm3, %v2934_v11, %v2217_v48 }
 0xc67   : > { %v2223_v52 = vmul.f32 %v2221_v49, %v2189_v27 }
 0xc69   : > { %v2228_v53 = vmul.f32 %v2869_v10, %v2223_v52 }
 0xc6b   : > { %v2233_v55 = vadd.f32 %v2870_v50, %v2228_v53 }
 0xc6d   : > { %v2238_v56 = vpack.c.bf16 %v2233_v55, %v2232_v54 }
 0xc6f   : > { %2697 = vmatmul.msk.bf16.vlgmr.msrb.gmra.mxu3 %vm807_vm0, %v2238_v56 }
 0xcf2   : > { %v2267_v24 = vpop.f32.mrf.mxu3 }
 0xcf3   : > { %v2268_v61 = vadd.f32 %v2871_v60, %v2267_v24 }
 0xcf5   : > { %v2272_v1 = vmax.f32 %v2268_v61, 0.0 }
 0xcfa   : > { %v2269_v63 = vpop.f32.mrf.mxu3 }
 0xcfb   : > { %v2270_v0 = vadd.f32 %v2871_v60, %v2269_v63 }
 0xcfd   : > { %v2273_v2 = vmax.f32 %v2270_v0, 0.0 }
 0xcff   : > { %v2282_v3 = vpack.c.bf16 %v2273_v2, %v2272_v1 }
 0xd01   : > { %2714 = vmatmul.msk.bf16.vlgmr.msra.gmra.mxu0 %vm2307_vm4, %v2282_v3 }
 0xd02   : > { %3084 = shalt.err (!%p3081_p12)
}
 0xd03   : > { %s3214_s3 = smov 128   ;;  %s3215_s4 = smov 8  }
 0xd04   : > { %2767 = dma.vmem_to_hbm [thread:$0]  (%p3413_p3), %s2381_s24, 256, %s2383_s29, %s3847_s22, %s3214_s3, %s3214_s3, %s3215_s4  }
 0xd05   : > { %s2396_s6 = scalar_lea.hbm %s3948_s20, %s3839_s17  ;;  %s2397_s8 = sshll.u32 %s3605_s26, 4  ;;  %s2398_s8 = int_to_ptr.vmem [resolvable:$true] %s2397_s8 }
 0xd06   : > { %s2399_s0 = sshll.u32 %s2396_s6, 4  ;;  %s3105_s9 = scalar_lea.hbm %s3948_s20, 32  ;;  %s2400_s0 = int_to_ptr.hbm [resolvable:$true] %s2399_s0 }
 0xd07   : > { %s3099_s2 = sshra.s32 %s2400_s0, 4  ;;  %s3100_s2 = int_to_ptr.hbm [resolvable:$true] %s3099_s2 }
 0xd08   : > { %s3101_s1 = scalar_lea.hbm %s3100_s2, 16  ;;  %p3106_p7 = scmp.lt.s32.totalorder %s3100_s2, %s3948_s20 }
 0xd09   : > { %p3102_p13 = scmp.ne.s32.totalorder %s3100_s2, %s3101_s1  ;;  %p3107_p8 = scmp.lt.s32.totalorder %s3105_s9, %s3101_s1 }
 0xd0b   : > { %p3103_p0 = pnand %p3102_p13, %p3413_p3  ;;  %p3108_p1 = por %p3107_p8, %p3106_p7 }
 0xd0d   : > { %p3104_p5 = pneg %p3103_p0 }
 0xd0f   : > { %p3109_p4 = pnand %p3108_p1, %p3104_p5 }
 0xd11   : > { %3112 = shalt.err (!%p3109_p4)
}
 0xd12   : > { %2768 = dma.vmem_to_hbm [thread:$0]  (%p3413_p3), %s2398_s8, 256, %s2400_s0, %s3847_s22, %s3214_s3, %s3214_s3, %s3215_s4  }
 0xd13   : > { %s3999_s14 = sld [smem:[#allocation36_spill]]  ;;  %s745_s9 = scalar_lea.vmem [#allocation10], %s3446_s23 }
 0xd14   : > { %s4000_s1 = sld [smem:[#allocation37_spill]]  ;;  %s2363_s18 = sshll.u32 %s745_s9, 4  ;;  %s2364_s18 = int_to_ptr.vmem [resolvable:$true] %s2363_s18 }
 0xd15   : > { %s2336_s8 = scalar_lea.sflag [#allocation4], %s3443_s28 }
 0xd19   : > { %v2872_v4 = vld [vmem:[%s3999_s14] ss:$0 sm:$0xff] }
 0xd1a   : > { %s2362_s5 = scalar_lea.hbm %s4000_s1, %s3839_s17  ;;  %s3133_s29 = scalar_lea.hbm %s4000_s1, 32 }
 0xd1b   : > { %s2365_s22 = sshll.u32 %s2362_s5, 4  ;;  %s2366_s22 = int_to_ptr.hbm [resolvable:$true] %s2365_s22 }
 0xd1c   : > { %s3127_s0 = sshra.s32 %s2366_s22, 4  ;;  %s3128_s0 = int_to_ptr.hbm [resolvable:$true] %s3127_s0 }
 0xd1d   : > { %s3129_s23 = scalar_lea.hbm %s3128_s0, 16  ;;  %p3134_p10 = scmp.lt.s32.totalorder %s3128_s0, %s4000_s1 }
 0xd1e   : > { %p3130_p11 = scmp.ne.s32.totalorder %s3128_s0, %s3129_s23  ;;  %p3135_p12 = scmp.lt.s32.totalorder %s3133_s29, %s3129_s23 }
 0xd20   : > { %p3131_p9 = pnand %p3130_p11, %p3413_p3  ;;  %p3136_p13 = por %p3135_p12, %p3134_p10 }
 0xd22   : > { %p3132_p2 = pneg %p3131_p9 }
 0xd24   : > { %p3137_p0 = pnand %p3136_p13, %p3132_p2 }
 0xd7e   : > { %v2320_v5 = vpop.f32.mrf.mxu0 }
 0xd7f   : > { %v2325_v7 = vadd.f32 %v2320_v5, %v3799_v6 }
 0xd81   : > { %v2331_v8 = vadd.f32 %v2872_v4, %v2325_v7 }
 0xd83   : > { %2333 = vst.msk [vmem:[%s745_s9] sm:$0xff] %vm807_vm0, %v2331_v8 }
 0xd86   : > { %v2322_v18 = vpop.f32.mrf.mxu0 }
 0xd87   : > { %v2326_v37 = vadd.f32 %v2322_v18, %v3804_v13 }
 0xd89   : > { %v2332_v9 = vadd.f32 %v2872_v4, %v2326_v37 }
 0xd8b   : > { %2334 = vst.msk [vmem:[%s745_s9 + $0x8] sm:$0xff] %vm807_vm0, %v2332_v9 }
 0xd8c   : > { %3140 = shalt.err (!%p3137_p0)
}
 0xd8d   : > { %2766 = dma.vmem_to_hbm [thread:$0]  (%p3413_p3), %s2364_s18, 256, %s2366_s22, %s2336_s8, %s3214_s3, %s3214_s3, %s3215_s4  }
 0xd8e PF: > { %s4001_s28 = sld [smem:[#allocation19_spill]]  ;;  %p4003_p5 = scmp.ge.s32.totalorder %s3191_s27, 2 }
 0xd90   : > { %p2787_p7 = pnand %p4003_p5, %p3363_p6 }
 0xd92   : > { %p2788_p8 = pneg %p2787_p7 }
 0xd94   : > { %s2417_s9 = sand.u32 1, %s4001_s28  }
 0xd95   : > { %s2418_s6 = scalar_lea.sflag [#allocation4], %s2417_s9 }
 0xd96   : > { %3170 = dma.done.wait (%p2788_p8), %s2418_s6, 256  }
 0xd97   : > { %3172 = vsyncadd (%p2788_p8), %s2418_s6, 4294967040  ;;  %s4004_s2 = sadd.s32 4294967294, %s3191_s27  }
 0xd98   : > { %s2427_s5 = sand.u32 1, %s4004_s2  }
 0xd99   : > { %s2428_s10 = scalar_lea.sflag [#allocation12], %s2427_s5 }
 0xd9a   : > { %3174 = dma.done.wait (%p2788_p8), %s2428_s10, 512  }
 0xd9b   : > { %3176 = vsyncadd (%p2788_p8), %s2428_s10, 4294966784  ;;  %s4005_s27 = sld [smem:[#allocation22_spill]]  ;;  %s4008_s2 = smov %s3183_s25 }
 0xd9c   : > { %s4006_s3 = sld [smem:[#allocation20_spill]] }
 0xd9d   : > { %s4007_s26 = sld [smem:[#allocation23_spill]] }
 0xda1   : > { %p40_p3 = scmp.ge.s32.totalorder %s4005_s27, 4  }
 0xda2   : > { %s4009_s25 = smov %s4006_s3 }
 0xda3   :  { %42 = sbr.rel (!%p40_p3) target bundleno = 24 (0x18), region = 196 }
 0xda8   :  { %2452 = vsyncpa [#allocation3], 1 }
 0xda9   :  { %2454 = vsyncpa [#allocation3 + $0x1], 1 }
 0xdaa   :  { %2455 = vsyncpa [#allocation6], 1 }
 0xdab   :  { %2456 = vsyncpa [#allocation9], 1 }
 0xdac   :  { %2457 = vsyncpa [#allocation4], 1 }
 0xdad   :  { %2459 = vsyncpa [#allocation4 + $0x1], 1 }
 0xdae   :  { %2460 = vsyncpa [#allocation12], 1 }
 0xdaf   :  { %2462 = vsyncpa [#allocation12 + $0x1], 1 }

</bundles_post_ra>
